<compile_context>
chip_gen: v7x
topology: tpu7x:2x2x1
jax: 0.10.0
libtpu: 0.0.40
codegen_flags: <defaults>
</compile_context>

<pallas_src>
import jax
import jax.numpy as jnp
from jax.experimental import pallas as pl
from jax.experimental.pallas import tpu as pltpu


def _round_up(n, m):
    return ((n + m - 1) // m) * m


def _cdiv(a, b):
    return (a + b - 1) // b


def _chip_vmem_bytes():
    """Physical VMEM per TensorCore; conservative (v7x, 64 MiB) fallback if unknown."""
    try:
        return int(pltpu.get_tpu_info().vmem_capacity_bytes)
    except Exception:
        return 64 << 20


def _mlp_kernel(x_ref, w1_ref, b1_ref, w2_ref, b2_ref, w3_ref, b3_ref, o_ref):
    # Layer 1: bf16 MXU matmul, f32 accumulation; bias add + ReLU in f32.
    h = jnp.dot(x_ref[...], w1_ref[...], preferred_element_type=jnp.float32)
    h = jnp.maximum(h + b1_ref[...], 0.0)
    # Layer 2 (hidden block): cast to bf16 only right before the MXU dot.
    h = jnp.dot(h.astype(w2_ref.dtype), w2_ref[...], preferred_element_type=jnp.float32)
    h = jnp.maximum(h + b2_ref[...], 0.0)
    # Layer 3 (last block: norm=None, relu=None -> no activation).
    y = jnp.dot(h.astype(w3_ref.dtype), w3_ref[...], preferred_element_type=jnp.float32)
    o_ref[...] = (y + b3_ref[...]).astype(o_ref.dtype)


def prepare_params(params):
    """One-time prep (do NOT redo per forward call): cast matmul operands to bf16,
    keep biases in f32, and zero-pad the last layer's output dim to a multiple of 128
    so the kernel's output store is lane-dense (no masked partial stores)."""
    nch_out = params["w3"].shape[1]
    n3 = _round_up(nch_out, 128)
    w3, b3 = params["w3"], params["b3"]
    if n3 != nch_out:
        w3 = jnp.pad(w3, ((0, 0), (0, n3 - nch_out)))
        b3 = jnp.pad(b3, ((0, 0), (0, n3 - nch_out)))
    prepped = {
        "w1": params["w1"].astype(jnp.bfloat16),
        "w2": params["w2"].astype(jnp.bfloat16),
        "w3": w3.astype(jnp.bfloat16),
        "b1": params["b1"].astype(jnp.float32),
        "b2": params["b2"].astype(jnp.float32),
        "b3": b3.astype(jnp.float32),
    }
    return prepped, nch_out


def _streamed_bytes(tm, nch_in, nch_ker, n3):
    # Double-buffered x (bf16) + out (f32) tiles, plus ~2 live f32 intermediates.
    return 2 * tm * (nch_in * 2 + n3 * 4) + 2 * tm * nch_ker * 4


def _pick_tm(B, nch_in, nch_ker, n3, stream_budget):
    # Large batch: biggest tile that fits the streaming VMEM budget and still yields
    # >= 2 grid steps (keeps both v7x TensorCores busy via "parallel" semantics).
    for cand in (512, 256, 128):
        if B >= 2 * cand and _streamed_bytes(cand, nch_in, nch_ker, n3) <= stream_budget:
            return cand
    # Small/medium batch: split roughly in half across two grid steps.
    tm = _round_up(max(_cdiv(B, 2), 1), 8)
    while tm > 8 and _streamed_bytes(tm, nch_in, nch_ker, n3) > stream_budget:
        tm -= 8
    return max(tm, 8)


def mlp_forward(x, prepped, nch_out, *, tm=None):
    """x: [B, C, H, W]. prepped: output of prepare_params(). Returns [B, nch_out] f32."""
    B = x.shape[0]
    x2d = x.reshape(B, -1)                               # matches x.view(x.size(0), -1)
    nch_in = x2d.shape[1]

    w1, w2, w3 = prepped["w1"], prepped["w2"], prepped["w3"]
    b1, b2, b3 = prepped["b1"], prepped["b2"], prepped["b3"]
    nch_ker = w1.shape[1]
    n3 = w3.shape[1]

    chip_vmem = _chip_vmem_bytes()
    headroom = 8 << 20                                   # compiler scratch / pipeline slack
    resident1x = (w1.size + w2.size + w3.size) * 2 + (b1.size + b2.size + b3.size) * 4
    stream_budget = max(chip_vmem - headroom - resident1x - (4 << 20), 2 << 20)

    if tm is None:
        tm = _pick_tm(B, nch_in, nch_ker, n3, stream_budget)
    tm = max(8, _round_up(tm, 8))

    # Pad batch; force >= 2 grid steps so a 2-TC chip (v7x) shards the batch axis.
    bp = max(_round_up(B, tm), 2 * tm)
    xb = x2d.astype(jnp.bfloat16)
    if bp != B:
        xb = jnp.pad(xb, ((0, bp - B), (0, 0)))
    grid = (bp // tm,)

    flops = 2 * bp * (nch_in * nch_ker + nch_ker * nch_ker + nch_ker * n3)
    bytes_accessed = xb.size * 2 + resident1x + bp * n3 * 4
    cost = pl.CostEstimate(flops=flops, transcendentals=0,
                           bytes_accessed=int(bytes_accessed))

    def run(single_buffer_weights):
        res_factor = 1 if single_buffer_weights else 2
        vmem_limit = (resident1x * res_factor
                      + _streamed_bytes(tm, nch_in, nch_ker, n3)
                      + headroom)
        vmem_limit = max(vmem_limit, 16 << 20)
        vmem_limit = min(vmem_limit, chip_vmem - (4 << 20))   # never exceed physical VMEM

        def const_spec(shape):
            if single_buffer_weights:
                # Constant index_map -> never re-DMA'd across grid steps; one buffer
                # halves the resident weight VMEM footprint.
                return pl.BlockSpec(shape, lambda i: (0, 0),
                                    pipeline_mode=pl.Buffered(1))
            return pl.BlockSpec(shape, lambda i: (0, 0))

        return pl.pallas_call(
            _mlp_kernel,
            out_shape=jax.ShapeDtypeStruct((bp, n3), jnp.float32),
            grid=grid,
            in_specs=[
                pl.BlockSpec((tm, nch_in), lambda i: (i, 0)),   # x: streamed per batch tile
                const_spec(w1.shape),
                const_spec(b1.shape),
                const_spec(w2.shape),
                const_spec(b2.shape),
                const_spec(w3.shape),
                const_spec(b3.shape),
            ],
            out_specs=pl.BlockSpec((tm, n3), lambda i: (i, 0)),
            compiler_params=pltpu.CompilerParams(
                dimension_semantics=("parallel",),
                vmem_limit_bytes=int(vmem_limit),
            ),
            cost_estimate=cost,
        )(xb, w1, b1, w2, b2, w3, b3)

    try:
        out = run(single_buffer_weights=True)
    except Exception:
        # Fallback if this JAX build rejects Buffered(1) on constant-index specs.
        out = run(single_buffer_weights=False)

    # Drop batch padding and the lane-padding columns of the last layer.
    return out[:B, :nch_out]


def init_params(key, nch_in, nch_out, nch_ker):
    """Deterministic synthetic parameters (nn.Linear shapes, stored transposed, f32)."""
    ks = jax.random.split(key, 6)

    def linear(kw, kb, fan_in, fan_out):
        bound = 1.0 / jnp.sqrt(fan_in)
        w = jax.random.uniform(kw, (fan_in, fan_out), jnp.float32, -bound, bound)
        b = jax.random.uniform(kb, (1, fan_out), jnp.float32, -bound, bound)
        return w, b

    w1, b1 = linear(ks[0], ks[1], nch_in, nch_ker)
    w2, b2 = linear(ks[2], ks[3], nch_ker, nch_ker)
    w3, b3 = linear(ks[4], ks[5], nch_ker, nch_out)
    return {"w1": w1, "b1": b1, "w2": w2, "b2": b2, "w3": w3, "b3": b3}


def mlp_reference(x, params):
    """Pure-JAX f32 reference (module semantics) for correctness check."""
    h = x.reshape(x.shape[0], -1)
    h = jnp.maximum(h @ params["w1"] + params["b1"], 0.0)
    h = jnp.maximum(h @ params["w2"] + params["b2"], 0.0)
    return h @ params["w3"] + params["b3"]


if __name__ == "__main__":
    key = jax.random.PRNGKey(0)
    k_x, k_p = jax.random.split(key)

    # Small shapes consistent with the module: NCHW input, flattened to nch_in.
    B, C, H, W = 2, 4, 16, 16
    nch_in = C * H * W          # 1024
    nch_ker = 256               # module default; MXU/lane friendly hidden width
    nch_out = 32
    # nblk = 3 -> Linear(nch_in,ker)+ReLU, Linear(ker,ker)+ReLU, Linear(ker,out)

    x = jax.random.normal(k_x, (B, C, H, W), jnp.float32)
    params = init_params(k_p, nch_in, nch_out, nch_ker)

    # One-time weight prep (bf16 cast + lane padding) — not repeated per call.
    prepped, nout = prepare_params(params)
    prepped = jax.tree_util.tree_map(jax.block_until_ready, prepped)

    out = mlp_forward(x, prepped, nout)
    out = jax.block_until_ready(out)

    ref = mlp_reference(x, params)
    assert out.shape == (B, nch_out)
    # bf16 matmul operands with f32 accumulation -> relaxed tolerance vs f32 reference.
    assert jnp.allclose(out, ref, atol=5e-2, rtol=5e-2)

    print("KERNEL_OK")
</pallas_src>

<mosaic_0001>
module attributes {stable_mosaic.version = 11 : i64} {
  func.func @_mlp_kernel(%arg0: i32, %arg1: memref<8x1024xbf16, #tpu.memory_space<vmem>>, %arg2: memref<1024x256xbf16, #tpu.memory_space<vmem>>, %arg3: memref<1x256xf32, #tpu.memory_space<vmem>>, %arg4: memref<256x256xbf16, #tpu.memory_space<vmem>>, %arg5: memref<1x256xf32, #tpu.memory_space<vmem>>, %arg6: memref<256x128xbf16, #tpu.memory_space<vmem>>, %arg7: memref<1x128xf32, #tpu.memory_space<vmem>>, %arg8: memref<8x128xf32, #tpu.memory_space<vmem>>) attributes {dimension_semantics = [#tpu.dimension_semantics<parallel>], iteration_bounds = array<i64: 2>, scalar_prefetch = 0 : i64, scratch_operands = 0 : i64, tpu.core_type = #tpu.core_type<tc>, window_params = [{transform_indices = @transform_0, window_bounds = array<i64: 8, 1024>}, {pipeline_mode = #tpu.pipeline_mode<synchronous>, transform_indices = @transform_1, window_bounds = array<i64: 1024, 256>}, {pipeline_mode = #tpu.pipeline_mode<synchronous>, transform_indices = @transform_2, window_bounds = array<i64: 1, 256>}, {pipeline_mode = #tpu.pipeline_mode<synchronous>, transform_indices = @transform_3, window_bounds = array<i64: 256, 256>}, {pipeline_mode = #tpu.pipeline_mode<synchronous>, transform_indices = @transform_4, window_bounds = array<i64: 1, 256>}, {pipeline_mode = #tpu.pipeline_mode<synchronous>, transform_indices = @transform_5, window_bounds = array<i64: 256, 128>}, {pipeline_mode = #tpu.pipeline_mode<synchronous>, transform_indices = @transform_6, window_bounds = array<i64: 1, 128>}, {transform_indices = @transform_7, window_bounds = array<i64: 8, 128>}]} {
    %c0 = arith.constant 0 : index
    %c0_0 = arith.constant 0 : index
    %0 = vector.load %arg1[%c0, %c0_0] : memref<8x1024xbf16, #tpu.memory_space<vmem>>, vector<8x1024xbf16>
    %c0_1 = arith.constant 0 : index
    %c0_2 = arith.constant 0 : index
    %1 = vector.load %arg2[%c0_1, %c0_2] : memref<1024x256xbf16, #tpu.memory_space<vmem>>, vector<1024x256xbf16>
    %cst = arith.constant dense<0.000000e+00> : vector<8x256xf32>
    %2 = tpu.matmul %0, %1, %cst {dimension_numbers = #tpu.dot_dimension_numbers<[1], [0], [0], [1], [0, 0, 1, 1], [], []>} : vector<8x1024xbf16>, vector<1024x256xbf16>, vector<8x256xf32> -> vector<8x256xf32>
    %c0_3 = arith.constant 0 : index
    %c0_4 = arith.constant 0 : index
    %3 = vector.load %arg3[%c0_3, %c0_4] : memref<1x256xf32, #tpu.memory_space<vmem>>, vector<1x256xf32>
    %4 = vector.broadcast %3 : vector<1x256xf32> to vector<8x256xf32>
    %5 = arith.addf %2, %4 : vector<8x256xf32>
    %cst_5 = arith.constant 0.000000e+00 : f32
    %6 = vector.broadcast %cst_5 : f32 to vector<8x256xf32>
    %7 = arith.maximumf %5, %6 : vector<8x256xf32>
    %8 = arith.truncf %7 : vector<8x256xf32> to vector<8x256xbf16>
    %c0_6 = arith.constant 0 : index
    %c0_7 = arith.constant 0 : index
    %9 = vector.load %arg4[%c0_6, %c0_7] : memref<256x256xbf16, #tpu.memory_space<vmem>>, vector<256x256xbf16>
    %cst_8 = arith.constant dense<0.000000e+00> : vector<8x256xf32>
    %10 = tpu.matmul %8, %9, %cst_8 {dimension_numbers = #tpu.dot_dimension_numbers<[1], [0], [0], [1], [0, 0, 1, 1], [], []>} : vector<8x256xbf16>, vector<256x256xbf16>, vector<8x256xf32> -> vector<8x256xf32>
    %c0_9 = arith.constant 0 : index
    %c0_10 = arith.constant 0 : index
    %11 = vector.load %arg5[%c0_9, %c0_10] : memref<1x256xf32, #tpu.memory_space<vmem>>, vector<1x256xf32>
    %12 = vector.broadcast %11 : vector<1x256xf32> to vector<8x256xf32>
    %13 = arith.addf %10, %12 : vector<8x256xf32>
    %cst_11 = arith.constant 0.000000e+00 : f32
    %14 = vector.broadcast %cst_11 : f32 to vector<8x256xf32>
    %15 = arith.maximumf %13, %14 : vector<8x256xf32>
    %16 = arith.truncf %15 : vector<8x256xf32> to vector<8x256xbf16>
    %c0_12 = arith.constant 0 : index
    %c0_13 = arith.constant 0 : index
    %17 = vector.load %arg6[%c0_12, %c0_13] : memref<256x128xbf16, #tpu.memory_space<vmem>>, vector<256x128xbf16>
    %cst_14 = arith.constant dense<0.000000e+00> : vector<8x128xf32>
    %18 = tpu.matmul %16, %17, %cst_14 {dimension_numbers = #tpu.dot_dimension_numbers<[1], [0], [0], [1], [0, 0, 1, 1], [], []>} : vector<8x256xbf16>, vector<256x128xbf16>, vector<8x128xf32> -> vector<8x128xf32>
    %c0_15 = arith.constant 0 : index
    %c0_16 = arith.constant 0 : index
    %19 = vector.load %arg7[%c0_15, %c0_16] : memref<1x128xf32, #tpu.memory_space<vmem>>, vector<1x128xf32>
    %20 = vector.broadcast %19 : vector<1x128xf32> to vector<8x128xf32>
    %21 = arith.addf %18, %20 : vector<8x128xf32>
    %c0_17 = arith.constant 0 : index
    %c0_18 = arith.constant 0 : index
    %22 = vector.load %arg8[%c0_17, %c0_18] : memref<8x128xf32, #tpu.memory_space<vmem>>, vector<8x128xf32>
    tpu.vector_store %arg8[%c0_17, %c0_18], %21 {strides = array<i32>} : memref<8x128xf32, #tpu.memory_space<vmem>>, vector<8x128xf32>,
    return
  }
  func.func @transform_0(%arg0: i32) -> (i32, i32) {
    %c0_i32 = arith.constant 0 : i32
    %c0_i32_0 = arith.constant 0 : i32
    return %arg0, %c0_i32 : i32, i32
  }
  func.func @transform_1(%arg0: i32) -> (i32, i32) {
    %c0_i32 = arith.constant 0 : i32
    %c0_i32_0 = arith.constant 0 : i32
    %c0_i32_1 = arith.constant 0 : i32
    return %c0_i32, %c0_i32_0 : i32, i32
  }
  func.func @transform_2(%arg0: i32) -> (i32, i32) {
    %c0_i32 = arith.constant 0 : i32
    %c0_i32_0 = arith.constant 0 : i32
    %c0_i32_1 = arith.constant 0 : i32
    return %c0_i32, %c0_i32_0 : i32, i32
  }
  func.func @transform_3(%arg0: i32) -> (i32, i32) {
    %c0_i32 = arith.constant 0 : i32
    %c0_i32_0 = arith.constant 0 : i32
    %c0_i32_1 = arith.constant 0 : i32
    return %c0_i32, %c0_i32_0 : i32, i32
  }
  func.func @transform_4(%arg0: i32) -> (i32, i32) {
    %c0_i32 = arith.constant 0 : i32
    %c0_i32_0 = arith.constant 0 : i32
    %c0_i32_1 = arith.constant 0 : i32
    return %c0_i32, %c0_i32_0 : i32, i32
  }
  func.func @transform_5(%arg0: i32) -> (i32, i32) {
    %c0_i32 = arith.constant 0 : i32
    %c0_i32_0 = arith.constant 0 : i32
    %c0_i32_1 = arith.constant 0 : i32
    return %c0_i32, %c0_i32_0 : i32, i32
  }
  func.func @transform_6(%arg0: i32) -> (i32, i32) {
    %c0_i32 = arith.constant 0 : i32
    %c0_i32_0 = arith.constant 0 : i32
    %c0_i32_1 = arith.constant 0 : i32
    return %c0_i32, %c0_i32_0 : i32, i32
  }
  func.func @transform_7(%arg0: i32) -> (i32, i32) {
    %c0_i32 = arith.constant 0 : i32
    %c0_i32_0 = arith.constant 0 : i32
    return %arg0, %c0_i32 : i32, i32
  }
}

module attributes {stable_mosaic.version = 11 : i64} {
  func.func @_mlp_kernel(%arg0: i32, %arg1: memref<8x1024xbf16, #tpu.memory_space<vmem>>, %arg2: memref<1024x256xbf16, #tpu.memory_space<vmem>>, %arg3: memref<1x256xf32, #tpu.memory_space<vmem>>, %arg4: memref<256x256xbf16, #tpu.memory_space<vmem>>, %arg5: memref<1x256xf32, #tpu.memory_space<vmem>>, %arg6: memref<256x128xbf16, #tpu.memory_space<vmem>>, %arg7: memref<1x128xf32, #tpu.memory_space<vmem>>, %arg8: memref<8x128xf32, #tpu.memory_space<vmem>>) attributes {dimension_semantics = [#tpu.dimension_semantics<parallel>], iteration_bounds = array<i64: 2>, scalar_prefetch = 0 : i64, scratch_operands = 0 : i64, tpu.core_type = #tpu.core_type<tc>, window_params = [{transform_indices = @transform_0, window_bounds = array<i64: 8, 1024>}, {pipeline_mode = #tpu.pipeline_mode<synchronous>, transform_indices = @transform_1, window_bounds = array<i64: 1024, 256>}, {pipeline_mode = #tpu.pipeline_mode<synchronous>, transform_indices = @transform_2, window_bounds = array<i64: 1, 256>}, {pipeline_mode = #tpu.pipeline_mode<synchronous>, transform_indices = @transform_3, window_bounds = array<i64: 256, 256>}, {pipeline_mode = #tpu.pipeline_mode<synchronous>, transform_indices = @transform_4, window_bounds = array<i64: 1, 256>}, {pipeline_mode = #tpu.pipeline_mode<synchronous>, transform_indices = @transform_5, window_bounds = array<i64: 256, 128>}, {pipeline_mode = #tpu.pipeline_mode<synchronous>, transform_indices = @transform_6, window_bounds = array<i64: 1, 128>}, {transform_indices = @transform_7, window_bounds = array<i64: 8, 128>}]} {
    %c0 = arith.constant 0 : index
    %c0_0 = arith.constant 0 : index
    %0 = vector.load %arg1[%c0, %c0_0] : memref<8x1024xbf16, #tpu.memory_space<vmem>>, vector<8x1024xbf16>
    %c0_1 = arith.constant 0 : index
    %c0_2 = arith.constant 0 : index
    %1 = vector.load %arg2[%c0_1, %c0_2] : memref<1024x256xbf16, #tpu.memory_space<vmem>>, vector<1024x256xbf16>
    %cst = arith.constant dense<0.000000e+00> : vector<8x256xf32>
    %2 = tpu.matmul %0, %1, %cst {dimension_numbers = #tpu.dot_dimension_numbers<[1], [0], [0], [1], [0, 0, 1, 1], [], []>} : vector<8x1024xbf16>, vector<1024x256xbf16>, vector<8x256xf32> -> vector<8x256xf32>
    %c0_3 = arith.constant 0 : index
    %c0_4 = arith.constant 0 : index
    %3 = vector.load %arg3[%c0_3, %c0_4] : memref<1x256xf32, #tpu.memory_space<vmem>>, vector<1x256xf32>
    %4 = vector.broadcast %3 : vector<1x256xf32> to vector<8x256xf32>
    %5 = arith.addf %2, %4 : vector<8x256xf32>
    %cst_5 = arith.constant 0.000000e+00 : f32
    %6 = vector.broadcast %cst_5 : f32 to vector<8x256xf32>
    %7 = arith.maximumf %5, %6 : vector<8x256xf32>
    %8 = arith.truncf %7 : vector<8x256xf32> to vector<8x256xbf16>
    %c0_6 = arith.constant 0 : index
    %c0_7 = arith.constant 0 : index
    %9 = vector.load %arg4[%c0_6, %c0_7] : memref<256x256xbf16, #tpu.memory_space<vmem>>, vector<256x256xbf16>
    %cst_8 = arith.constant dense<0.000000e+00> : vector<8x256xf32>
    %10 = tpu.matmul %8, %9, %cst_8 {dimension_numbers = #tpu.dot_dimension_numbers<[1], [0], [0], [1], [0, 0, 1, 1], [], []>} : vector<8x256xbf16>, vector<256x256xbf16>, vector<8x256xf32> -> vector<8x256xf32>
    %c0_9 = arith.constant 0 : index
    %c0_10 = arith.constant 0 : index
    %11 = vector.load %arg5[%c0_9, %c0_10] : memref<1x256xf32, #tpu.memory_space<vmem>>, vector<1x256xf32>
    %12 = vector.broadcast %11 : vector<1x256xf32> to vector<8x256xf32>
    %13 = arith.addf %10, %12 : vector<8x256xf32>
    %cst_11 = arith.constant 0.000000e+00 : f32
    %14 = vector.broadcast %cst_11 : f32 to vector<8x256xf32>
    %15 = arith.maximumf %13, %14 : vector<8x256xf32>
    %16 = arith.truncf %15 : vector<8x256xf32> to vector<8x256xbf16>
    %c0_12 = arith.constant 0 : index
    %c0_13 = arith.constant 0 : index
    %17 = vector.load %arg6[%c0_12, %c0_13] : memref<256x128xbf16, #tpu.memory_space<vmem>>, vector<256x128xbf16>
    %cst_14 = arith.constant dense<0.000000e+00> : vector<8x128xf32>
    %18 = tpu.matmul %16, %17, %cst_14 {dimension_numbers = #tpu.dot_dimension_numbers<[1], [0], [0], [1], [0, 0, 1, 1], [], []>} : vector<8x256xbf16>, vector<256x128xbf16>, vector<8x128xf32> -> vector<8x128xf32>
    %c0_15 = arith.constant 0 : index
    %c0_16 = arith.constant 0 : index
    %19 = vector.load %arg7[%c0_15, %c0_16] : memref<1x128xf32, #tpu.memory_space<vmem>>, vector<1x128xf32>
    %20 = vector.broadcast %19 : vector<1x128xf32> to vector<8x128xf32>
    %21 = arith.addf %18, %20 : vector<8x128xf32>
    %c0_17 = arith.constant 0 : index
    %c0_18 = arith.constant 0 : index
    %22 = vector.load %arg8[%c0_17, %c0_18] : memref<8x128xf32, #tpu.memory_space<vmem>>, vector<8x128xf32>
    tpu.vector_store %arg8[%c0_17, %c0_18], %21 {strides = array<i32>} : memref<8x128xf32, #tpu.memory_space<vmem>>, vector<8x128xf32>,
    return
  }
  func.func @transform_0(%arg0: i32) -> (i32, i32) {
    %c0_i32 = arith.constant 0 : i32
    %c0_i32_0 = arith.constant 0 : i32
    return %arg0, %c0_i32 : i32, i32
  }
  func.func @transform_1(%arg0: i32) -> (i32, i32) {
    %c0_i32 = arith.constant 0 : i32
    %c0_i32_0 = arith.constant 0 : i32
    %c0_i32_1 = arith.constant 0 : i32
    return %c0_i32, %c0_i32_0 : i32, i32
  }
  func.func @transform_2(%arg0: i32) -> (i32, i32) {
    %c0_i32 = arith.constant 0 : i32
    %c0_i32_0 = arith.constant 0 : i32
    %c0_i32_1 = arith.constant 0 : i32
    return %c0_i32, %c0_i32_0 : i32, i32
  }
  func.func @transform_3(%arg0: i32) -> (i32, i32) {
    %c0_i32 = arith.constant 0 : i32
    %c0_i32_0 = arith.constant 0 : i32
    %c0_i32_1 = arith.constant 0 : i32
    return %c0_i32, %c0_i32_0 : i32, i32
  }
  func.func @transform_4(%arg0: i32) -> (i32, i32) {
    %c0_i32 = arith.constant 0 : i32
    %c0_i32_0 = arith.constant 0 : i32
    %c0_i32_1 = arith.constant 0 : i32
    return %c0_i32, %c0_i32_0 : i32, i32
  }
  func.func @transform_5(%arg0: i32) -> (i32, i32) {
    %c0_i32 = arith.constant 0 : i32
    %c0_i32_0 = arith.constant 0 : i32
    %c0_i32_1 = arith.constant 0 : i32
    return %c0_i32, %c0_i32_0 : i32, i32
  }
  func.func @transform_6(%arg0: i32) -> (i32, i32) {
    %c0_i32 = arith.constant 0 : i32
    %c0_i32_0 = arith.constant 0 : i32
    %c0_i32_1 = arith.constant 0 : i32
    return %c0_i32, %c0_i32_0 : i32, i32
  }
  func.func @transform_7(%arg0: i32) -> (i32, i32) {
    %c0_i32 = arith.constant 0 : i32
    %c0_i32_0 = arith.constant 0 : i32
    return %arg0, %c0_i32 : i32, i32
  }
}

</mosaic_0001>

<bundles_post_ra>
// kernel: tpu_custom_call.1
= control target key start
LH: loop header
LB: loop body
LE: loop exit
PB: predicated region body
PF: predicated region fallthrough
CT: control target
= control target key end

     0   :  { %12 = vsyncpa [#allocation3], 0  ;;  %s2969_s0 = inlined_call_operand.hbm [shape: bf16[16,1024], index: 0, kind: input, shape index: {}]   ;;  %s2970_s1 = inlined_call_operand.hbm [shape: bf16[1024,256], index: 1, kind: input, shape index: {}]   ;;  %s2971_s2 = inlined_call_operand.vmem [shape: f32[1,256], index: 2, kind: input, shape index: {}]   ;;  %s2972_s3 = inlined_call_operand.hbm [shape: bf16[256,256], index: 3, kind: input, shape index: {}]   ;;  %s2973_s4 = inlined_call_operand.vmem [shape: f32[1,256], index: 4, kind: input, shape index: {}]   ;;  %s2974_s5 = inlined_call_operand.hbm [shape: bf16[256,128], index: 5, kind: input, shape index: {}]   ;;  %s2975_s6 = inlined_call_operand.vmem [shape: f32[1,128], index: 6, kind: input, shape index: {}]   ;;  %s2976_s7 = inlined_call_operand.hbm [shape: f32[16,128], index: 7, kind: output, shape index: {}]  }
   0x1   :  { %14 = vsyncpa [#allocation3 + $0x1], 0 }
   0x2   :  { %15 = vsyncpa [#allocation6], 0 }
   0x3   :  { %16 = vsyncpa [#allocation9], 0 }
   0x4   :  { %17 = vsyncpa [#allocation4], 0 }
   0x5   :  { %19 = vsyncpa [#allocation4 + $0x1], 0  ;;  %s2681_s24 = smov 0   ;;  %s2683_s25 = smov 0  }
   0x6   :  { %s2685_s26 = smov 0   ;;  %s2687_s27 = smov 0  }
   0x7 LB: > { %s2702_s28 = sadd.s32 4294967295, %s2630_s27   ;;  %s1858_s29 = sadd.s32 4294967294, %s2630_s27   ;;  %s2630_s27 = sphi %s2687_s27, %s3002_s27   ;;  %s2626_s26 = sphi %s2685_s26, %s3001_s26   ;;  %s2622_s25 = sphi %s2683_s25, %s3000_s25   ;;  %s2618_s24 = sphi %s2681_s24, %s2999_s24  }
   0x8   : > { %p45_p0 = scmp.ne.s32.totalorder %s2622_s25, %s2618_s24  ;;  %p2977_p1 = scmp.eq.s32.totalorder %s2702_s28, 0 }
   0x9   : > { %p201_p3 = scmp.eq.s32.totalorder %s1858_s29, 1  ;;  %p1859_p5 = scmp.ge.s32.totalorder %s2630_s27, 1 }
   0xa   : > { %p2711_p4 = por %p2977_p1, %p45_p0  ;;  %p208_p7 = scmp.lt.s32.totalorder %s2630_s27, 3 }
   0xb   : > { %p2716_p6 = por %p201_p3, %p45_p0  ;;  %s2632_s10 = smov [#allocation5]  }
   0xc   : > { %s2981_s30 = scalar_select %p2711_p4, 1, 0 }
   0xd   : > { %s2982_s8 = scalar_select %p2716_p6, 1, 0 }
   0xe   : > { %p2721_p8 = pnand %p1859_p5, %p208_p7  ;;  %s220_s11 = sshll.u32 %s2632_s10, 4  ;;  %s2725_s11 = int_to_ptr.vmem [resolvable:$true] %s220_s11 }
   0xf   : > { %2983 = sst [smem:[#allocation15_spill]] %s2982_s8  ;;  %s2633_s13 = smov [#allocation7]  }
  0x10   : > { %s2984_s9 = scalar_select %p2721_p8, 1, 0 }
  0x11   : > { %p2113_p9 = pneg %p2721_p8  ;;  %s236_s14 = sshll.u32 %s2633_s13, 4  ;;  %s2736_s14 = int_to_ptr.vmem [resolvable:$true] %s236_s14 }
  0x12   : > { %s2634_s15 = smov [#allocation8]   ;;  %s2442_s19 = scalar_lea.hbm %s2970_s1, 16384 }
  0x13   : > { %p2732_p11 = pnand %p2113_p9, %p2977_p1  ;;  %s2738_s16 = sshll.u32 %s2634_s15, 4  ;;  %s253_s16 = int_to_ptr.vmem [resolvable:$true] %s2738_s16 }
  0x14   : > { %p2443_p12 = scmp.ne.s32.totalorder %s2970_s1, %s2442_s19  ;;  %p2449_p5 = scmp.lt.u32.totalorder %s2442_s19, %s2970_s1 }
  0x15   : > { %p2748_p13 = pneg %p2732_p11 }
  0x17   : > { %p2445_p0 = pnand %p2748_p13, %p2443_p12 }
  0x19   : > { %p2446_p3 = pneg %p2445_p0 }
  0x1b   : > { %p2451_p7 = pnand %p2449_p5, %p2446_p3 }
  0x1d   : > { %2454 = shalt.err (!%p2451_p7)
}
  0x1e   : > { %s2455_s10 = scalar_lea.vmem %s2725_s11, 16384  ;;  %p2463_p2 = scmp.lt.s32.totalorder %s2725_s11, %s2725_s11 }
  0x1f   : > { %p2456_p9 = scmp.ne.s32.totalorder %s2725_s11, %s2455_s10  ;;  %p2464_p6 = scmp.lt.s32.totalorder %s2455_s10, %s2455_s10 }
  0x21   : > { %p2458_p10 = pnand %p2456_p9, %p2748_p13  ;;  %p2465_p12 = por %p2464_p6, %p2463_p2 }
  0x23   : > { %p2459_p1 = pneg %p2458_p10 }
  0x25   : > { %p2466_p0 = pnand %p2465_p12, %p2459_p1 }
  0x27   : > { %2469 = shalt.err (!%p2466_p0)
}
  0x28   : > { %s2635_s13 = smov 128   ;;  %s2636_s15 = smov 8  }
  0x29   : > { %2116 = dma.hbm_to_vmem [thread:$0]  (!%p2732_p11), %s2970_s1, 16384, %s2725_s11, [#allocation6], %s2635_s13, %s2635_s13, %s2636_s15  }
  0x2a   : > { %s2470_s21 = scalar_lea.hbm %s2972_s3, 4096 }
  0x2b   : > { %p2471_p2 = scmp.ne.s32.totalorder %s2972_s3, %s2470_s21  ;;  %p2477_p10 = scmp.lt.u32.totalorder %s2470_s21, %s2972_s3 }
  0x2d   : > { %p2473_p1 = pnand %p2471_p2, %p2748_p13 }
  0x2f   : > { %p2474_p6 = pneg %p2473_p1 }
  0x31   : > { %p2479_p3 = pnand %p2477_p10, %p2474_p6 }
  0x33   : > { %2482 = shalt.err (!%p2479_p3)
}
  0x34   : > { %s2483_s11 = scalar_lea.vmem %s2736_s14, 4096  ;;  %p2491_p12 = scmp.lt.s32.totalorder %s2736_s14, %s2736_s14 }
  0x35   : > { %p2484_p5 = scmp.ne.s32.totalorder %s2736_s14, %s2483_s11  ;;  %p2492_p0 = scmp.lt.s32.totalorder %s2483_s11, %s2483_s11 }
  0x37   : > { %p2486_p7 = pnand %p2484_p5, %p2748_p13  ;;  %p2493_p2 = por %p2492_p0, %p2491_p12 }
  0x39   : > { %p2487_p9 = pneg %p2486_p7 }
  0x3b   : > { %p2494_p1 = pnand %p2493_p2, %p2487_p9 }
  0x3d   : > { %2497 = shalt.err (!%p2494_p1)
}
  0x3e   : > { %2119 = dma.hbm_to_vmem [thread:$0]  (!%p2732_p11), %s2972_s3, 4096, %s2736_s14, [#allocation6], %s2635_s13, %s2635_s13, %s2636_s15  }
  0x3f   : > { %s2498_s20 = scalar_lea.hbm %s2974_s5, 2048 }
  0x40   : > { %p2499_p6 = scmp.ne.s32.totalorder %s2974_s5, %s2498_s20  ;;  %p2505_p5 = scmp.lt.u32.totalorder %s2498_s20, %s2974_s5 }
  0x42   : > { %p2501_p10 = pnand %p2499_p6, %p2748_p13 }
  0x44   : > { %p2502_p3 = pneg %p2501_p10 }
  0x46   : > { %p2507_p7 = pnand %p2505_p5, %p2502_p3 }
  0x48   : > { %2510 = shalt.err (!%p2507_p7)
}
  0x49   : > { %s2511_s11 = scalar_lea.vmem %s253_s16, 2048  ;;  %p2519_p2 = scmp.lt.s32.totalorder %s253_s16, %s253_s16 }
  0x4a   : > { %p2512_p9 = scmp.ne.s32.totalorder %s253_s16, %s2511_s11  ;;  %p2520_p1 = scmp.lt.s32.totalorder %s2511_s11, %s2511_s11 }
  0x4c   : > { %p2514_p12 = pnand %p2512_p9, %p2748_p13  ;;  %p2521_p4 = por %p2520_p1, %p2519_p2 }
  0x4e   : > { %p2515_p0 = pneg %p2514_p12 }
  0x50   : > { %p2522_p8 = pnand %p2521_p4, %p2515_p0 }
  0x52   : > { %2525 = shalt.err (!%p2522_p8)
}
  0x53   : > { %s2637_s14 = smov 64   ;;  %s2638_s22 = smov 4  }
  0x54   : > { %2122 = dma.hbm_to_vmem [thread:$0]  (!%p2732_p11), %s2974_s5, 2048, %s253_s16, [#allocation9], %s2637_s14, %s2637_s14, %s2638_s22  }
  0x55   : > { %s2812_s8 = sadd.s32 1, %s2630_s27   ;;  %s32_s18 = sadd.s32 1, %s2626_s26 }
  0x56   : > { %s29_s17 = ssub.s32 %s2630_s27, %s2812_s8  ;;  %p39_p8 = scmp.ne.s32.totalorder %s2626_s26, %s2622_s25 }
  0x57   : > { %p30_p4 = scmp.eq.s32.totalorder %s29_s17, 0  ;;  %p40_p13 = scmp.eq.s32.totalorder %s2630_s27, 0 }
  0x58   : > { %p2134_p6 = scmp.lt.s32.totalorder %s2630_s27, 2  ;;  %p2987_p3 = scmp.eq.s32.totalorder %s2702_s28, 1 }
  0x59   : > { %s2822_s19 = scalar_select %p30_p4, %s2626_s26, %s32_s18  }
  0x5a   : > { %p41_p10 = por %p40_p13, %p39_p8  ;;  %p2826_p5 = por %p2987_p3, %p39_p8 }
  0x5b   : > { %s269_s12 = sand.u32 1, %s2626_s26   ;;  %s2062_s21 = sshll.u32 %s2630_s27, 9 }
  0x5c   : > { %s1864_s16 = sshll.u32 %s269_s12, 5  ;;  %s2835_s10 = scalar_lea.hbm %s2969_s0, %s2062_s21 }
  0x5d   : > { %s273_s11 = scalar_lea.vmem [#allocation2], %s1864_s16  ;;  %p2837_p11 = pnand %p2134_p6, %p41_p10 }
  0x5e   : > { %s281_s14 = sshll.u32 %s273_s11, 4  ;;  %s270_s13 = scalar_lea.sflag [#allocation3], %s269_s12  ;;  %s2841_s14 = int_to_ptr.vmem [resolvable:$true] %s281_s14 }
  0x5f   : > { %s2526_s15 = scalar_lea.hbm %s2835_s10, 512  ;;  %p2528_p9 = pneg %p2837_p11 }
  0x60   : > { %p2527_p7 = scmp.ne.s32.totalorder %s2835_s10, %s2526_s15  ;;  %s2531_s21 = scalar_lea.hbm %s2969_s0, 1024 }
  0x61   : > { %p2532_p2 = scmp.lt.u32.totalorder %s2835_s10, %s2969_s0  ;;  %p2533_p1 = scmp.lt.u32.totalorder %s2531_s21, %s2526_s15 }
  0x62   : > { %p2529_p12 = pnand %p2528_p9, %p2527_p7  ;;  %p2535_p8 = scmp.lt.u32.totalorder %s2526_s15, %s2835_s10 }
  0x63   : > { %p2534_p4 = por %p2533_p1, %p2532_p2 }
  0x64   : > { %p2530_p0 = pneg %p2529_p12 }
  0x65   : > { %p2536_p13 = por %p2535_p8, %p2534_p4 }
  0x67   : > { %p2537_p6 = pnand %p2536_p13, %p2530_p0 }
  0x69   : > { %2540 = shalt.err (!%p2537_p6)
}
  0x6a   : > { %s2541_s12 = scalar_lea.vmem %s2841_s14, 512  ;;  %s2639_s29 = smov [#allocation2]  }
  0x6b   : > { %p2542_p10 = scmp.ne.s32.totalorder %s2841_s14, %s2541_s12  ;;  %s2546_s11 = sshll.u32 %s2639_s29, 4  ;;  %s2547_s11 = int_to_ptr.vmem [resolvable:$false] %s2546_s11 }
  0x6c   : > { %s2548_s17 = scalar_lea.vmem %s2547_s11, 1024  ;;  %p2549_p12 = scmp.lt.s32.totalorder %s2841_s14, %s2547_s11 }
  0x6d   : > { %p2544_p3 = pnand %p2542_p10, %p2528_p9  ;;  %p2550_p2 = scmp.lt.s32.totalorder %s2548_s17, %s2541_s12 }
  0x6f   : > { %p2545_p7 = pneg %p2544_p3  ;;  %p2551_p1 = por %p2550_p2, %p2549_p12 }
  0x71   : > { %p2552_p4 = pnand %p2551_p1, %p2545_p7 }
  0x73   : > { %2555 = shalt.err (!%p2552_p4)
}
  0x74   : > { %2126 = dma.hbm_to_vmem [thread:$0]  (!%p2837_p11), %s2835_s10, 512, %s2841_s14, %s270_s13  }
  0x75   : > { %p2990_p0 = scmp.ne.s32.totalorder %s2984_s9, 0 }
  0x76   : > { %s2871_s15 = sand.u32 (!%p2990_p0), 1, %s2622_s25   ;;  %p2991_p9 = scmp.ne.s32.totalorder (!%p2990_p0), %s2981_s30, 0 }
  0x77   : > { %290 = sbr.rel (%p2990_p0) target bundleno = 998 (0x3e6), region = 48  ;;  %s1868_s18 = sshll.u32 (!%p2990_p0), %s2871_s15, 5 }
  0x78   : > { %s293_s21 = scalar_lea.sflag (!%p2990_p0), [#allocation3], %s2871_s15  ;;  %s2875_s16 = scalar_lea.vmem (!%p2990_p0), [#allocation2], %s1868_s18 }
  0x7e   : > { %2601 = dma.done.wait (%p2991_p9), %s293_s21, 512  }
  0x7f   : > { %2603 = vsyncadd (%p2991_p9), %s293_s21, 4294966784  ;;  %p2992_p11 = scmp.eq.s32.totalorder %s2702_s28, 0 }
  0x81   : > { %2605 = dma.done.wait (%p2992_p11), [#allocation6], 20480   ;;  %p2993_p8 = pmov %p2992_p11 }
  0x83   : > { %2607 = vsyncadd (%p2993_p8), [#allocation6], 4294946816  ;;  %p2994_p13 = pmov %p2993_p8 }
  0x84   : > { %p2995_p6 = pmov %p2993_p8 }
  0x85   : > { %2609 = dma.done.wait (%p2994_p13), [#allocation9], 2048  }
  0x86   : > { %2611 = vsyncadd (%p2995_p6), [#allocation9], 4294965248  ;;  %v2178_v0 = vld [vmem:[#allocation5 + $0x104] ss:$8 sps:$4 sm:$0xff]   ;;  %v2180_v1 = vld [vmem:[#allocation5 + $0x100] ss:$8 sps:$4 sm:$0xff]  }
  0x87   : > { %1193 = vmatprep.subr.bf16.mxu0 %v2178_v0  ;;  %v2181_v2 = vld [vmem:[#allocation5 + $0x114] ss:$8 sps:$4 sm:$0xff]   ;;  %v2183_v3 = vld [vmem:[#allocation5 + $0x110] ss:$8 sps:$4 sm:$0xff]   ;;  %v2184_v4 = vld [vmem:[#allocation5 + $0x124] ss:$8 sps:$4 sm:$0xff]  }
  0x88   : > { %1194 = vmatpush1.bf16.msra.mxu0 %v2180_v1  ;;  %v2186_v5 = vld [vmem:[#allocation5 + $0x120] ss:$8 sps:$4 sm:$0xff]   ;;  %v2187_v6 = vld [vmem:[#allocation5 + $0x134] ss:$8 sps:$4 sm:$0xff]   ;;  %v2189_v7 = vld [vmem:[#allocation5 + $0x130] ss:$8 sps:$4 sm:$0xff]  }
  0x89   : > { %1195 = vmatprep.subr.bf16.mxu0 %v2181_v2  ;;  %v2190_v8 = vld [vmem:[#allocation5 + $0x144] ss:$8 sps:$4 sm:$0xff]   ;;  %v2192_v9 = vld [vmem:[#allocation5 + $0x140] ss:$8 sps:$4 sm:$0xff]   ;;  %v2193_v10 = vld [vmem:[#allocation5 + $0x154] ss:$8 sps:$4 sm:$0xff]  }
  0x8a   : > { %v2195_v11 = vld [vmem:[#allocation5 + $0x150] ss:$8 sps:$4 sm:$0xff]   ;;  %v2196_v12 = vld [vmem:[#allocation5 + $0x164] ss:$8 sps:$4 sm:$0xff]   ;;  %v2198_v15 = vld [vmem:[#allocation5 + $0x160] ss:$8 sps:$4 sm:$0xff]  }
  0x8b   : > { %v2890_v13 = vld [vmem:[%s2875_s16 + $0x8] sm:$0xff]  ;;  %v2199_v16 = vld [vmem:[#allocation5 + $0x174] ss:$8 sps:$4 sm:$0xff]   ;;  %v2201_v17 = vld [vmem:[#allocation5 + $0x170] ss:$8 sps:$4 sm:$0xff]   ;;  %s1872_s22 = sshll.u32 %s2871_s15, 3 }
  0x8c   : > { %1196 = vmatpush1.bf16.msra.mxu0 %v2183_v3  ;;  %v1876_v14 = vcombine.high %v2890_v13, %v2890_v13  ;;  %v2202_v18 = vld [vmem:[#allocation5 + $0x184] ss:$8 sps:$4 sm:$0xff]   ;;  %v2204_v19 = vld [vmem:[#allocation5 + $0x180] ss:$8 sps:$4 sm:$0xff]   ;;  %v2205_v20 = vld [vmem:[#allocation5 + $0x194] ss:$8 sps:$4 sm:$0xff]   ;;  %v1875_v48 = vcombine.low %v2890_v13, %v2890_v13 }
  0x8d   : > { %1197 = vmatprep.subr.bf16.mxu0 %v2184_v4  ;;  %v2207_v21 = vld [vmem:[#allocation5 + $0x190] ss:$8 sps:$4 sm:$0xff]   ;;  %v2208_v22 = vld [vmem:[#allocation5 + $0x1a4] ss:$8 sps:$4 sm:$0xff]   ;;  %v2210_v23 = vld [vmem:[#allocation5 + $0x1a0] ss:$8 sps:$4 sm:$0xff]  }
  0x8e   : > { %1225 = vmatprep.mubr.bf16.mxu0 %v1876_v14  ;;  %v2211_v24 = vld [vmem:[#allocation5 + $0x1b4] ss:$8 sps:$4 sm:$0xff]   ;;  %v2273_v25 = vld [vmem:[#allocation5 + $0x4] ss:$8 sps:$4 sm:$0xff]   ;;  %v2275_v26 = vld [vmem:[#allocation5] ss:$8 sps:$4 sm:$0xff]  }
  0x8f   : > { %v2213_v27 = vld [vmem:[#allocation5 + $0x1b0] ss:$8 sps:$4 sm:$0xff]   ;;  %v2214_v28 = vld [vmem:[#allocation5 + $0x1c4] ss:$8 sps:$4 sm:$0xff]   ;;  %1152 = vmatprep.subr.bf16.mxu1 %v2273_v25  ;;  %v2279_v29 = vld [vmem:[#allocation5 + $0x14] ss:$8 sps:$4 sm:$0xff]  }
  0x90   : > { %1198 = vmatpush1.bf16.msra.mxu0 %v2186_v5  ;;  %1153 = vmatpush1.bf16.msra.mxu1 %v2275_v26  ;;  %v2281_v30 = vld [vmem:[#allocation5 + $0x10] ss:$8 sps:$4 sm:$0xff]   ;;  %v2216_v31 = vld [vmem:[#allocation5 + $0x1c0] ss:$8 sps:$4 sm:$0xff]   ;;  %v2217_v32 = vld [vmem:[#allocation5 + $0x1d4] ss:$8 sps:$4 sm:$0xff]  }
  0x91   : > { %1199 = vmatprep.subr.bf16.mxu0 %v2187_v6  ;;  %1154 = vmatprep.subr.bf16.mxu1 %v2279_v29  ;;  %v2287_v33 = vld [vmem:[#allocation5 + $0x24] ss:$8 sps:$4 sm:$0xff]   ;;  %v2289_v34 = vld [vmem:[#allocation5 + $0x20] ss:$8 sps:$4 sm:$0xff]   ;;  %v2293_v35 = vld [vmem:[#allocation5 + $0x34] ss:$8 sps:$4 sm:$0xff]  }
  0x92   : > { %v2219_v36 = vld [vmem:[#allocation5 + $0x1d0] ss:$8 sps:$4 sm:$0xff]   ;;  %v2220_v37 = vld [vmem:[#allocation5 + $0x1e4] ss:$8 sps:$4 sm:$0xff]   ;;  %v2222_v40 = vld [vmem:[#allocation5 + $0x1e0] ss:$8 sps:$4 sm:$0xff]  }
  0x93   : > { %v2295_v38 = vld [vmem:[#allocation5 + $0x30] ss:$8 sps:$4 sm:$0xff]   ;;  %v2299_v39 = vld [vmem:[#allocation5 + $0x44] ss:$8 sps:$4 sm:$0xff]   ;;  %v2223_v41 = vld [vmem:[#allocation5 + $0x1f4] ss:$8 sps:$4 sm:$0xff]  }
  0x94   : > { %1200 = vmatpush1.bf16.msra.mxu0 %v2189_v7  ;;  %1155 = vmatpush1.bf16.msra.mxu1 %v2281_v30  ;;  %v2301_v42 = vld [vmem:[#allocation5 + $0x40] ss:$8 sps:$4 sm:$0xff]   ;;  %v2305_v43 = vld [vmem:[#allocation5 + $0x54] ss:$8 sps:$4 sm:$0xff]   ;;  %v2225_v44 = vld [vmem:[#allocation5 + $0x1f0] ss:$8 sps:$4 sm:$0xff]  }
  0x95   : > { %1201 = vmatprep.subr.bf16.mxu0 %v2190_v8  ;;  %1156 = vmatprep.subr.bf16.mxu1 %v2287_v33  ;;  %v2230_v45 = vld [vmem:[#allocation5 + $0x204] ss:$8 sps:$4 sm:$0xff]   ;;  %v2895_v46 = vld [vmem:[%s2875_s16 + $0x10] sm:$0xff]  ;;  %v2228_v50 = vld [vmem:[#allocation5 + $0x200] ss:$8 sps:$4 sm:$0xff]   ;;  %s2059_s12 = sshll.u32 %s2702_s28, 7 }
  0x96   : > { %v2307_v47 = vld [vmem:[#allocation5 + $0x50] ss:$8 sps:$4 sm:$0xff]   ;;  %v2311_v49 = vld [vmem:[#allocation5 + $0x64] ss:$8 sps:$4 sm:$0xff]   ;;  %v1878_v51 = vcombine.high %v2895_v46, %v2895_v46  ;;  %v2233_v52 = vld [vmem:[#allocation5 + $0x214] ss:$8 sps:$4 sm:$0xff]   ;;  %s2925_s21 = scalar_lea.hbm %s2976_s7, %s2059_s12 }
  0x97   : > { %v2313_v53 = vld [vmem:[#allocation5 + $0x60] ss:$8 sps:$4 sm:$0xff]   ;;  %v2317_v54 = vld [vmem:[#allocation5 + $0x74] ss:$8 sps:$4 sm:$0xff]   ;;  %v2231_v55 = vld [vmem:[#allocation5 + $0x210] ss:$8 sps:$4 sm:$0xff]  }
  0x98   : > { %1202 = vmatpush1.bf16.msra.mxu0 %v2192_v9  ;;  %1157 = vmatpush1.bf16.msra.mxu1 %v2289_v34  ;;  %v2236_v56 = vld [vmem:[#allocation5 + $0x224] ss:$8 sps:$4 sm:$0xff]   ;;  %v2319_v57 = vld [vmem:[#allocation5 + $0x70] ss:$8 sps:$4 sm:$0xff]   ;;  %v2234_v59 = vld [vmem:[#allocation5 + $0x220] ss:$8 sps:$4 sm:$0xff]  }
  0x99   : > { %1203 = vmatprep.subr.bf16.mxu0 %v2193_v10  ;;  %1158 = vmatprep.subr.bf16.mxu1 %v2293_v35  ;;  %v2323_v58 = vld [vmem:[#allocation5 + $0x84] ss:$8 sps:$4 sm:$0xff]   ;;  %v2239_v60 = vld [vmem:[#allocation5 + $0x234] ss:$8 sps:$4 sm:$0xff]   ;;  %v2325_v61 = vld [vmem:[#allocation5 + $0x80] ss:$8 sps:$4 sm:$0xff]  }
  0x9a   : > { %v2329_v62 = vld [vmem:[#allocation5 + $0x94] ss:$8 sps:$4 sm:$0xff]   ;;  %v2237_v63 = vld [vmem:[#allocation5 + $0x230] ss:$8 sps:$4 sm:$0xff]   ;;  %v2242_v0 = vld [vmem:[#allocation5 + $0x244] ss:$8 sps:$4 sm:$0xff]  }
  0x9b   : > { %v2331_v1 = vld [vmem:[#allocation5 + $0x90] ss:$8 sps:$4 sm:$0xff]   ;;  %v2335_v2 = vld [vmem:[#allocation5 + $0xa4] ss:$8 sps:$4 sm:$0xff]   ;;  %v2240_v3 = vld [vmem:[#allocation5 + $0x240] ss:$8 sps:$4 sm:$0xff]  }
  0x9c   : > { %1204 = vmatpush1.bf16.msra.mxu0 %v2195_v11  ;;  %1159 = vmatpush1.bf16.msra.mxu1 %v2295_v38  ;;  %v2245_v4 = vld [vmem:[#allocation5 + $0x254] ss:$8 sps:$4 sm:$0xff]   ;;  %v2337_v5 = vld [vmem:[#allocation5 + $0xa0] ss:$8 sps:$4 sm:$0xff]   ;;  %v2243_v7 = vld [vmem:[#allocation5 + $0x250] ss:$8 sps:$4 sm:$0xff]  }
  0x9d   : > { %1205 = vmatprep.subr.bf16.mxu0 %v2196_v12  ;;  %1160 = vmatprep.subr.bf16.mxu1 %v2299_v39  ;;  %v2341_v6 = vld [vmem:[#allocation5 + $0xb4] ss:$8 sps:$4 sm:$0xff]   ;;  %v2248_v8 = vld [vmem:[#allocation5 + $0x264] ss:$8 sps:$4 sm:$0xff]   ;;  %v2343_v10 = vld [vmem:[#allocation5 + $0xb0] ss:$8 sps:$4 sm:$0xff]  }
  0x9e   : > { %v340_v9 = vld [vmem:[%s2875_s16] sm:$0xff]  ;;  %v2251_v14 = vld [vmem:[#allocation5 + $0x274] ss:$8 sps:$4 sm:$0xff]   ;;  %v2255_v25 = vld [vmem:[#allocation5 + $0x290] ss:$8 sps:$4 sm:$0xff]   ;;  %s338_s29 = scalar_lea.vmem [#allocation10], %s1872_s22 }
  0x9f   : > { %v1874_v11 = vcombine.high %v340_v9, %v340_v9  ;;  %v2347_v12 = vld [vmem:[#allocation5 + $0xc4] ss:$8 sps:$4 sm:$0xff]   ;;  %v2246_v13 = vld [vmem:[#allocation5 + $0x260] ss:$8 sps:$4 sm:$0xff]   ;;  %v2263_v30 = vld [vmem:[#allocation5 + $0x2b4] ss:$8 sps:$4 sm:$0xff]  }
  0xa0   : > { %1206 = vmatpush1.bf16.msra.mxu0 %v2198_v15  ;;  %1161 = vmatpush1.bf16.msra.mxu1 %v2301_v42  ;;  %v2349_v15 = vld [vmem:[#allocation5 + $0xc0] ss:$8 sps:$4 sm:$0xff]   ;;  %v2260_v26 = vld [vmem:[#allocation5 + $0x2a4] ss:$8 sps:$4 sm:$0xff]   ;;  %v2383_v33 = vld [vmem:[#allocation7 + $0x14] ss:$8 sps:$4 sm:$0xff]  }
  0xa1   : > { %1207 = vmatprep.subr.bf16.mxu0 %v2199_v16  ;;  %1162 = vmatprep.subr.bf16.mxu1 %v2305_v43  ;;  %v2353_v16 = vld [vmem:[#allocation5 + $0xd4] ss:$8 sps:$4 sm:$0xff]   ;;  %v2380_v29 = vld [vmem:[#allocation7 + $0x4] ss:$8 sps:$4 sm:$0xff]   ;;  %v2261_v34 = vld [vmem:[#allocation5 + $0x2b0] ss:$8 sps:$4 sm:$0xff]  }
  0xa2   : > { %1184 = vmatprep.mubr.bf16.mxu1 %v1874_v11  ;;  %v2266_v35 = vld [vmem:[#allocation5 + $0x2c4] ss:$8 sps:$4 sm:$0xff]   ;;  %v2264_v38 = vld [vmem:[#allocation5 + $0x2c0] ss:$8 sps:$4 sm:$0xff]   ;;  %v2269_v39 = vld [vmem:[#allocation5 + $0x2d4] ss:$8 sps:$4 sm:$0xff]  }
  0xa3   : > { %v2267_v42 = vld [vmem:[#allocation5 + $0x2d0] ss:$8 sps:$4 sm:$0xff]   ;;  %v2272_v43 = vld [vmem:[#allocation5 + $0x2e4] ss:$8 sps:$4 sm:$0xff]   ;;  %v2408_v11 = vld [vmem:[#allocation7 + $0xa0] ss:$8 sps:$4 sm:$0xff]  }
  0xa4   : > { %1208 = vmatpush1.bf16.msra.mxu0 %v2201_v17  ;;  %1163 = vmatpush1.bf16.msra.mxu1 %v2307_v47  ;;  %v2249_v17 = vld [vmem:[#allocation5 + $0x270] ss:$8 sps:$4 sm:$0xff]   ;;  %v2270_v47 = vld [vmem:[#allocation5 + $0x2e0] ss:$8 sps:$4 sm:$0xff]   ;;  %s1759_s11 = sshll.u32 %s338_s29, 4  ;;  %s2640_s28 = smov [#allocation10]   ;;  %s2927_s11 = int_to_ptr.vmem [resolvable:$true] %s1759_s11 }
  0xa5   : > { %1209 = vmatprep.subr.bf16.mxu0 %v2202_v18  ;;  %1164 = vmatprep.subr.bf16.mxu1 %v2311_v49  ;;  %v2254_v18 = vld [vmem:[#allocation5 + $0x284] ss:$8 sps:$4 sm:$0xff]   ;;  %v2390_v49 = vld [vmem:[#allocation7 + $0x40] ss:$8 sps:$4 sm:$0xff]   ;;  %s2556_s30 = scalar_lea.vmem %s2927_s11, 128  ;;  %s2560_s9 = sshll.u32 %s2640_s28, 4  ;;  %s2561_s9 = int_to_ptr.vmem [resolvable:$false] %s2560_s9 }
  0xa6   : > { %p2557_p10 = scmp.ne.s32.totalorder %s2927_s11, %s2556_s30  ;;  %s2562_s10 = scalar_lea.vmem %s2561_s9, 256 }
  0xa7   : > { %p2563_p12 = scmp.lt.s32.totalorder %s2927_s11, %s2561_s9  ;;  %p2564_p2 = scmp.lt.s32.totalorder %s2562_s10, %s2556_s30 }
  0xa8   : > { %1210 = vmatpush1.bf16.msra.mxu0 %v2204_v19  ;;  %1165 = vmatpush1.bf16.msra.mxu1 %v2313_v53  ;;  %v2355_v19 = vld [vmem:[#allocation5 + $0xd0] ss:$8 sps:$4 sm:$0xff]   ;;  %p2558_p3 = pnand %p2557_p10, %p2826_p5 }
  0xa9   : > { %1211 = vmatprep.subr.bf16.mxu0 %v2205_v20  ;;  %1166 = vmatprep.subr.bf16.mxu1 %v2317_v54  ;;  %v2359_v20 = vld [vmem:[#allocation5 + $0xe4] ss:$8 sps:$4 sm:$0xff]   ;;  %v2903_v53 = vld [vmem:[%s2875_s16 + $0x18] sm:$0xff]  ;;  %s1746_s16 = scalar_lea.sflag [#allocation4], %s2871_s15  ;;  %p2565_p1 = por %p2564_p2, %p2563_p12 }
  0xaa   : > { %v2393_v54 = vld [vmem:[#allocation7 + $0x50] ss:$8 sps:$4 sm:$0xff]   ;;  %p2559_p7 = pneg %p2558_p3 }
  0xac   : > { %1212 = vmatpush1.bf16.msra.mxu0 %v2207_v21  ;;  %1167 = vmatpush1.bf16.msra.mxu1 %v2319_v57  ;;  %v2252_v21 = vld [vmem:[#allocation5 + $0x280] ss:$8 sps:$4 sm:$0xff]   ;;  %p2566_p4 = pnand %p2565_p1, %p2559_p7 }
  0xad   : > { %1213 = vmatprep.subr.bf16.mxu0 %v2208_v22  ;;  %1168 = vmatprep.subr.bf16.mxu1 %v2323_v58  ;;  %v2257_v22 = vld [vmem:[#allocation5 + $0x294] ss:$8 sps:$4 sm:$0xff]   ;;  %v2284_v57 = vld [vmem:[#allocation5 + $0x300] ss:$8 sps:$4 sm:$0xff]   ;;  %v1880_v58 = vcombine.high %v2903_v53, %v2903_v53 }
  0xb0   : > { %1214 = vmatpush1.bf16.msra.mxu0 %v2210_v23  ;;  %1169 = vmatpush1.bf16.msra.mxu1 %v2325_v61  ;;  %v2361_v23 = vld [vmem:[#allocation5 + $0xe0] ss:$8 sps:$4 sm:$0xff]   ;;  %v2401_v61 = vld [vmem:[#allocation7 + $0x74] ss:$8 sps:$4 sm:$0xff]  }
  0xb1   : > { %1215 = vmatprep.subr.bf16.mxu0 %v2211_v24  ;;  %1170 = vmatprep.subr.bf16.mxu1 %v2329_v62  ;;  %v2365_v24 = vld [vmem:[#allocation5 + $0xf4] ss:$8 sps:$4 sm:$0xff]   ;;  %v2290_v62 = vld [vmem:[#allocation5 + $0x310] ss:$8 sps:$4 sm:$0xff]  }
  0xb4   : > { %1216 = vmatpush1.bf16.msra.mxu0 %v2213_v27  ;;  %1171 = vmatpush1.bf16.msra.mxu1 %v2331_v1  ;;  %v2367_v27 = vld [vmem:[#allocation5 + $0xf0] ss:$8 sps:$4 sm:$0xff]   ;;  %v2296_v1 = vld [vmem:[#allocation5 + $0x320] ss:$8 sps:$4 sm:$0xff]  }
  0xb5   : > { %1217 = vmatprep.subr.bf16.mxu0 %v2214_v28  ;;  %1172 = vmatprep.subr.bf16.mxu1 %v2335_v2  ;;  %v2258_v28 = vld [vmem:[#allocation5 + $0x2a0] ss:$8 sps:$4 sm:$0xff]   ;;  %v2304_v2 = vld [vmem:[#allocation5 + $0x334] ss:$8 sps:$4 sm:$0xff]  }
  0xb8   : > { %1218 = vmatpush1.bf16.msra.mxu0 %v2216_v31  ;;  %1173 = vmatpush1.bf16.msra.mxu1 %v2337_v5  ;;  %v2378_v31 = vld [vmem:[#allocation7] ss:$8 sps:$4 sm:$0xff]   ;;  %v2302_v5 = vld [vmem:[#allocation5 + $0x330] ss:$8 sps:$4 sm:$0xff]  }
  0xb9   : > { %1219 = vmatprep.subr.bf16.mxu0 %v2217_v32  ;;  %1174 = vmatprep.subr.bf16.mxu1 %v2341_v6  ;;  %v1873_v32 = vcombine.low %v340_v9, %v340_v9  ;;  %v2310_v6 = vld [vmem:[#allocation5 + $0x344] ss:$8 sps:$4 sm:$0xff]   ;;  %v2308_v9 = vld [vmem:[#allocation5 + $0x340] ss:$8 sps:$4 sm:$0xff]  }
  0xbc   : > { %1220 = vmatpush1.bf16.msra.mxu0 %v2219_v36  ;;  %1175 = vmatpush1.bf16.msra.mxu1 %v2343_v10  ;;  %v2381_v36 = vld [vmem:[#allocation7 + $0x10] ss:$8 sps:$4 sm:$0xff]   ;;  %v2316_v10 = vld [vmem:[#allocation5 + $0x354] ss:$8 sps:$4 sm:$0xff]  }
  0xbd   : > { %1221 = vmatprep.subr.bf16.mxu0 %v2220_v37  ;;  %1176 = vmatprep.subr.bf16.mxu1 %v2347_v12  ;;  %v2386_v37 = vld [vmem:[#allocation7 + $0x24] ss:$8 sps:$4 sm:$0xff]   ;;  %v2413_v12 = vld [vmem:[#allocation7 + $0xb4] ss:$8 sps:$4 sm:$0xff]  }
  0xc0   : > { %1222 = vmatpush1.bf16.msra.mxu0 %v2222_v40  ;;  %1177 = vmatpush1.bf16.msra.mxu1 %v2349_v15  ;;  %v2384_v40 = vld [vmem:[#allocation7 + $0x20] ss:$8 sps:$4 sm:$0xff]   ;;  %v2411_v15 = vld [vmem:[#allocation7 + $0xb0] ss:$8 sps:$4 sm:$0xff]  }
  0xc1   : > { %1223 = vmatprep.subr.bf16.mxu0 %v2223_v41  ;;  %1178 = vmatprep.subr.bf16.mxu1 %v2353_v16  ;;  %v2389_v41 = vld [vmem:[#allocation7 + $0x34] ss:$8 sps:$4 sm:$0xff]   ;;  %v2416_v16 = vld [vmem:[#allocation7 + $0xc4] ss:$8 sps:$4 sm:$0xff]  }
  0xc4   : > { %1224 = vmatpush1.bf16.msra.mxu0 %v2225_v44  ;;  %1179 = vmatpush1.bf16.msra.mxu1 %v2355_v19  ;;  %v2387_v44 = vld [vmem:[#allocation7 + $0x30] ss:$8 sps:$4 sm:$0xff]   ;;  %v2414_v19 = vld [vmem:[#allocation7 + $0xc0] ss:$8 sps:$4 sm:$0xff]  }
  0xc5   : > { %1234 = vmatprep.subr.bf16.mxu0 %v2230_v45  ;;  %1180 = vmatprep.subr.bf16.mxu1 %v2359_v20  ;;  %v2392_v45 = vld [vmem:[#allocation7 + $0x44] ss:$8 sps:$4 sm:$0xff]   ;;  %v2326_v20 = vld [vmem:[#allocation5 + $0x370] ss:$8 sps:$4 sm:$0xff]  }
  0xc7   : > { %1226 = vmatmul.mubr.bf16.vlgmr.msra.gmra.mrb[0].mxu0 %v1875_v48  ;;  %v2278_v48 = vld [vmem:[#allocation5 + $0x2f4] ss:$8 sps:$4 sm:$0xff]  }
  0xc8   : > { %1235 = vmatpush1.bf16.msra.mxu0 %v2228_v50  ;;  %1266 = vmatprep.mubr.bf16.mxu0 %v1878_v51  ;;  %v2395_v50 = vld [vmem:[#allocation7 + $0x54] ss:$8 sps:$4 sm:$0xff]   ;;  %v2276_v51 = vld [vmem:[#allocation5 + $0x2f0] ss:$8 sps:$4 sm:$0xff]  }
  0xc9   : > { %1236 = vmatprep.subr.bf16.mxu0 %v2233_v52  ;;  %1181 = vmatpush1.bf16.msra.mxu1 %v2361_v23  ;;  %v2286_v52 = vld [vmem:[#allocation5 + $0x304] ss:$8 sps:$4 sm:$0xff]   ;;  %v2340_v23 = vld [vmem:[#allocation5 + $0x394] ss:$8 sps:$4 sm:$0xff]  }
  0xca   : > { %1182 = vmatprep.subr.bf16.mxu1 %v2365_v24  ;;  %v2338_v24 = vld [vmem:[#allocation5 + $0x390] ss:$8 sps:$4 sm:$0xff]  }
  0xcc   : > { %1237 = vmatpush1.bf16.msra.mxu0 %v2231_v55  ;;  %v1877_v55 = vcombine.low %v2895_v46, %v2895_v46  ;;  %v2399_v46 = vld [vmem:[#allocation7 + $0x70] ss:$8 sps:$4 sm:$0xff]  }
  0xcd   : > { %1238 = vmatprep.subr.bf16.mxu0 %v2236_v56  ;;  %1183 = vmatpush1.bf16.msra.mxu1 %v2367_v27  ;;  %v2398_v56 = vld [vmem:[#allocation7 + $0x64] ss:$8 sps:$4 sm:$0xff]   ;;  %v2352_v27 = vld [vmem:[#allocation5 + $0x3b4] ss:$8 sps:$4 sm:$0xff]  }
  0xce   : > { %1524 = vmatprep.subr.bf16.mxu1 %v2380_v29  ;;  %v2358_v29 = vld [vmem:[#allocation5 + $0x3c4] ss:$8 sps:$4 sm:$0xff]  }
  0xd0   : > { %1239 = vmatpush1.bf16.msra.mxu0 %v2234_v59  ;;  %1185 = vmatmul.mubr.bf16.vlgmr.msra.gmra.mrb[0].mxu1 %v1873_v32  ;;  %v2292_v59 = vld [vmem:[#allocation5 + $0x314] ss:$8 sps:$4 sm:$0xff]   ;;  %v2362_v32 = vld [vmem:[#allocation5 + $0x3d0] ss:$8 sps:$4 sm:$0xff]  }
  0xd1   : > { %1240 = vmatprep.subr.bf16.mxu0 %v2239_v60  ;;  %1525 = vmatpush1.bf16.msra.mxu1 %v2378_v31  ;;  %v2396_v60 = vld [vmem:[#allocation7 + $0x60] ss:$8 sps:$4 sm:$0xff]   ;;  %v2364_v31 = vld [vmem:[#allocation5 + $0x3d4] ss:$8 sps:$4 sm:$0xff]  }
  0xd2   : > { %1526 = vmatprep.subr.bf16.mxu1 %v2383_v33  ;;  %v2370_v33 = vld [vmem:[#allocation5 + $0x3e4] ss:$8 sps:$4 sm:$0xff]  }
  0xd4   : > { %1241 = vmatpush1.bf16.msra.mxu0 %v2237_v63  ;;  %v2298_v63 = vld [vmem:[#allocation5 + $0x324] ss:$8 sps:$4 sm:$0xff]  }
  0xd5   : > { %1242 = vmatprep.subr.bf16.mxu0 %v2242_v0  ;;  %1527 = vmatpush1.bf16.msra.mxu1 %v2381_v36  ;;  %v2404_v0 = vld [vmem:[#allocation7 + $0x84] ss:$8 sps:$4 sm:$0xff]   ;;  %v2373_v36 = vld [vmem:[#allocation5 + $0x3f0] ss:$8 sps:$4 sm:$0xff]  }
  0xd6   : > { %1528 = vmatprep.subr.bf16.mxu1 %v2386_v37  ;;  %v1879_v37 = vcombine.low %v2903_v53, %v2903_v53  ;;  %v472_v53 = vld [vmem:[%s2971_s2] sm:$0x3] }
  0xd8   : > { %1243 = vmatpush1.bf16.msra.mxu0 %v2240_v3  ;;  %v2402_v3 = vld [vmem:[#allocation7 + $0x80] ss:$8 sps:$4 sm:$0xff]  }
  0xd9   : > { %1244 = vmatprep.subr.bf16.mxu0 %v2245_v4  ;;  %1529 = vmatpush1.bf16.msra.mxu1 %v2384_v40  ;;  %v2407_v4 = vld [vmem:[#allocation7 + $0x94] ss:$8 sps:$4 sm:$0xff]   ;;  %v2422_v40 = vld [vmem:[#allocation7 + $0xe4] ss:$8 sps:$4 sm:$0xff]  }
  0xda   : > { %1530 = vmatprep.subr.bf16.mxu1 %v2389_v41  ;;  %v2420_v41 = vld [vmem:[#allocation7 + $0xe0] ss:$8 sps:$4 sm:$0xff]  }
  0xdc   : > { %1245 = vmatpush1.bf16.msra.mxu0 %v2243_v7  ;;  %v2405_v7 = vld [vmem:[#allocation7 + $0x90] ss:$8 sps:$4 sm:$0xff]  }
  0xdd   : > { %1246 = vmatprep.subr.bf16.mxu0 %v2248_v8  ;;  %1531 = vmatpush1.bf16.msra.mxu1 %v2387_v44  ;;  %v2410_v8 = vld [vmem:[#allocation7 + $0xa4] ss:$8 sps:$4 sm:$0xff]  }
  0xde   : > { %1532 = vmatprep.subr.bf16.mxu1 %v2392_v45  ;;  %v2426_v44 = vld [vmem:[#allocation8 + $0x40] sm:$0xff]  }
  0xe0   : > { %1247 = vmatpush1.bf16.msra.mxu0 %v2246_v13  ;;  %v2314_v13 = vld [vmem:[#allocation5 + $0x350] ss:$8 sps:$4 sm:$0xff]  }
  0xe1   : > { %1248 = vmatprep.subr.bf16.mxu0 %v2251_v14  ;;  %1533 = vmatpush1.bf16.msra.mxu1 %v2390_v49  ;;  %v2322_v14 = vld [vmem:[#allocation5 + $0x364] ss:$8 sps:$4 sm:$0xff]  }
  0xe2   : > { %1534 = vmatprep.subr.bf16.mxu1 %v2395_v50  ;;  %v474_v50 = vlaneseq }
  0xe4   : > { %1249 = vmatpush1.bf16.msra.mxu0 %v2249_v17  ;;  %v2320_v17 = vld [vmem:[#allocation5 + $0x360] ss:$8 sps:$4 sm:$0xff]  }
  0xe5   : > { %1250 = vmatprep.subr.bf16.mxu0 %v2254_v18  ;;  %1535 = vmatpush1.bf16.msra.mxu1 %v2393_v54  ;;  %v2328_v18 = vld [vmem:[#allocation5 + $0x374] ss:$8 sps:$4 sm:$0xff]  }
  0xe6   : > { %1536 = vmatprep.subr.bf16.mxu1 %v2398_v56 }
  0xe8   : > { %1251 = vmatpush1.bf16.msra.mxu0 %v2252_v21  ;;  %v2334_v21 = vld [vmem:[#allocation5 + $0x384] ss:$8 sps:$4 sm:$0xff]  }
  0xe9   : > { %1252 = vmatprep.subr.bf16.mxu0 %v2257_v22  ;;  %1537 = vmatpush1.bf16.msra.mxu1 %v2396_v60  ;;  %v2332_v22 = vld [vmem:[#allocation5 + $0x380] ss:$8 sps:$4 sm:$0xff]  }
  0xea   : > { %1538 = vmatprep.subr.bf16.mxu1 %v2401_v61 }
  0xec   : > { %1253 = vmatpush1.bf16.msra.mxu0 %v2255_v25  ;;  %v2346_v25 = vld [vmem:[#allocation5 + $0x3a4] ss:$8 sps:$4 sm:$0xff]  }
  0xed   : > { %1254 = vmatprep.subr.bf16.mxu0 %v2260_v26  ;;  %1539 = vmatpush1.bf16.msra.mxu1 %v2399_v46  ;;  %v2344_v26 = vld [vmem:[#allocation5 + $0x3a0] ss:$8 sps:$4 sm:$0xff]  }
  0xee   : > { %1540 = vmatprep.subr.bf16.mxu1 %v2404_v0 }
  0xf0   : > { %1255 = vmatpush1.bf16.msra.mxu0 %v2258_v28  ;;  %v2350_v28 = vld [vmem:[#allocation5 + $0x3b0] ss:$8 sps:$4 sm:$0xff]  }
  0xf1   : > { %1256 = vmatprep.subr.bf16.mxu0 %v2263_v30  ;;  %1541 = vmatpush1.bf16.msra.mxu1 %v2402_v3  ;;  %v2356_v30 = vld [vmem:[#allocation5 + $0x3c0] ss:$8 sps:$4 sm:$0xff]  }
  0xf2   : > { %1542 = vmatprep.subr.bf16.mxu1 %v2407_v4  ;;  %v2427_v3 = vld [vmem:[#allocation8] sm:$0xff]  }
  0xf4   : > { %1257 = vmatpush1.bf16.msra.mxu0 %v2261_v34  ;;  %v2368_v34 = vld [vmem:[#allocation5 + $0x3e0] ss:$8 sps:$4 sm:$0xff]  }
  0xf5   : > { %1258 = vmatprep.subr.bf16.mxu0 %v2266_v35  ;;  %1543 = vmatpush1.bf16.msra.mxu1 %v2405_v7  ;;  %v2375_v35 = vld [vmem:[#allocation5 + $0x3f4] ss:$8 sps:$4 sm:$0xff]  }
  0xf6   : > { %1544 = vmatprep.subr.bf16.mxu1 %v2410_v8  ;;  %v2430_v7 = vld [vmem:[#allocation8 + $0x50] sm:$0xff]  }
  0xf7   : > { %v2431_v8 = vld [vmem:[#allocation8 + $0x10] sm:$0xff]  }
  0xf8   : > { %1259 = vmatpush1.bf16.msra.mxu0 %v2264_v38  ;;  %v2417_v38 = vld [vmem:[#allocation7 + $0xd0] ss:$8 sps:$4 sm:$0xff]  }
  0xf9   : > { %1260 = vmatprep.subr.bf16.mxu0 %v2269_v39  ;;  %1545 = vmatpush1.bf16.msra.mxu1 %v2408_v11  ;;  %v2419_v39 = vld [vmem:[#allocation7 + $0xd4] ss:$8 sps:$4 sm:$0xff]   ;;  %v2434_v11 = vld [vmem:[#allocation8 + $0x60] sm:$0xff]  }
  0xfa   : > { %1546 = vmatprep.subr.bf16.mxu1 %v2413_v12  ;;  %v2435_v12 = vld [vmem:[#allocation8 + $0x20] sm:$0xff]  }
  0xfc   : > { %1261 = vmatpush1.bf16.msra.mxu0 %v2267_v42  ;;  %v2425_v42 = vld [vmem:[#allocation7 + $0xf4] ss:$8 sps:$4 sm:$0xff]  }
  0xfd   : > { %1262 = vmatprep.subr.bf16.mxu0 %v2272_v43  ;;  %1547 = vmatpush1.bf16.msra.mxu1 %v2411_v15  ;;  %v2423_v43 = vld [vmem:[#allocation7 + $0xf0] ss:$8 sps:$4 sm:$0xff]  }
  0xfe   : > { %1548 = vmatprep.subr.bf16.mxu1 %v2416_v16  ;;  %v2438_v15 = vld [vmem:[#allocation8 + $0x70] sm:$0xff]  }
  0xff   : > { %v2439_v16 = vld [vmem:[#allocation8 + $0x30] sm:$0xff]  }
 0x100   : > { %1263 = vmatpush1.bf16.msra.mxu0 %v2270_v47 }
 0x101   : > { %1264 = vmatprep.subr.bf16.mxu0 %v2278_v48  ;;  %1549 = vmatpush1.bf16.msra.mxu1 %v2414_v19  ;;  %v1352_v19 = vld [vmem:[%s2973_s4] sm:$0x3] }
 0x102   : > { %1550 = vmatprep.subr.bf16.mxu1 %v2419_v39 }
 0x104   : > { %1265 = vmatpush1.bf16.msra.mxu0 %v2276_v51  ;;  %v475_v51 = vshrl.u32 %v474_v50, 7 }
 0x105   : > { %1275 = vmatprep.subr.bf16.mxu0 %v2286_v52  ;;  %1551 = vmatpush1.bf16.msra.mxu1 %v2417_v38 }
 0x106   : > { %1552 = vmatprep.subr.bf16.mxu1 %v2422_v40  ;;  %v476_v52 = vsub.s32 0, %v475_v51  ;;  %v480_v54 = vsub.s32 1, %v475_v51 }
 0x107   : > { %1267 = vmatmul.mubr.bf16.vlgmr.msra.gmra.mrb[0].mxu0 %v1877_v55 }
 0x108   : > { %1276 = vmatpush1.bf16.msra.mxu0 %v2284_v57  ;;  %1307 = vmatprep.mubr.bf16.mxu0 %v1880_v58  ;;  %v477_v55 = vrot.slane %v472_v53, %v476_v52  ;;  %v481_v56 = vrot.slane %v472_v53, %v480_v54 }
 0x109   : > { %1277 = vmatprep.subr.bf16.mxu0 %v2292_v59  ;;  %1553 = vmatpush1.bf16.msra.mxu1 %v2420_v41 }
 0x10a   : > { %1554 = vmatprep.subr.bf16.mxu1 %v2425_v42 }
 0x10c   : > { %1278 = vmatpush1.bf16.msra.mxu0 %v2290_v62 }
 0x10d   : > { %1279 = vmatprep.subr.bf16.mxu0 %v2298_v63  ;;  %1555 = vmatpush1.bf16.msra.mxu1 %v2423_v43 }
 0x10e   : > { %2063 = vmatprep.subr.bf16.mxu1 %v2426_v44 }
 0x110   : > { %1280 = vmatpush1.bf16.msra.mxu0 %v2296_v1 }
 0x111   : > { %1281 = vmatprep.subr.bf16.mxu0 %v2304_v2 }
 0x114   : > { %1282 = vmatpush1.bf16.msra.mxu0 %v2302_v5  ;;  %v2428_v5 = vld [vmem:[#allocation8 + $0x48] sm:$0xff]  }
 0x115   : > { %1283 = vmatprep.subr.bf16.mxu0 %v2310_v6  ;;  %v2429_v6 = vld [vmem:[#allocation8 + $0x8] sm:$0xff]  }
 0x118   : > { %1284 = vmatpush1.bf16.msra.mxu0 %v2308_v9  ;;  %v2432_v9 = vld [vmem:[#allocation8 + $0x58] sm:$0xff]  }
 0x119   : > { %1285 = vmatprep.subr.bf16.mxu0 %v2316_v10  ;;  %v2433_v10 = vld [vmem:[#allocation8 + $0x18] sm:$0xff]  }
 0x11c   : > { %1286 = vmatpush1.bf16.msra.mxu0 %v2314_v13  ;;  %v2436_v13 = vld [vmem:[#allocation8 + $0x68] sm:$0xff]  }
 0x11d   : > { %1287 = vmatprep.subr.bf16.mxu0 %v2322_v14  ;;  %v2437_v14 = vld [vmem:[#allocation8 + $0x28] sm:$0xff]  }
 0x120   : > { %1288 = vmatpush1.bf16.msra.mxu0 %v2320_v17  ;;  %v2440_v17 = vld [vmem:[#allocation8 + $0x78] sm:$0xff]  }
 0x121   : > { %1289 = vmatprep.subr.bf16.mxu0 %v2328_v18  ;;  %v2441_v18 = vld [vmem:[#allocation8 + $0x38] sm:$0xff]  }
 0x124   : > { %1290 = vmatpush1.bf16.msra.mxu0 %v2326_v20  ;;  %v1357_v20 = vrot.slane %v1352_v19, %v476_v52 }
 0x125   : > { %1291 = vmatprep.subr.bf16.mxu0 %v2334_v21  ;;  %v1361_v21 = vrot.slane %v1352_v19, %v480_v54 }
 0x128   : > { %1292 = vmatpush1.bf16.msra.mxu0 %v2332_v22 }
 0x129   : > { %1293 = vmatprep.subr.bf16.mxu0 %v2340_v23 }
 0x12c   : > { %1294 = vmatpush1.bf16.msra.mxu0 %v2338_v24 }
 0x12d   : > { %1295 = vmatprep.subr.bf16.mxu0 %v2346_v25 }
 0x130   : > { %1296 = vmatpush1.bf16.msra.mxu0 %v2344_v26 }
 0x131   : > { %1297 = vmatprep.subr.bf16.mxu0 %v2352_v27 }
 0x134   : > { %1298 = vmatpush1.bf16.msra.mxu0 %v2350_v28 }
 0x135   : > { %1299 = vmatprep.subr.bf16.mxu0 %v2358_v29 }
 0x138   : > { %1300 = vmatpush1.bf16.msra.mxu0 %v2356_v30 }
 0x139   : > { %1301 = vmatprep.subr.bf16.mxu0 %v2364_v31 }
 0x13c   : > { %1302 = vmatpush1.bf16.msra.mxu0 %v2362_v32 }
 0x13d   : > { %1303 = vmatprep.subr.bf16.mxu0 %v2370_v33  ;;  %v2041_v33 = vld [vmem:[%s2975_s6] ss:$0 sm:$0xff] }
 0x140   : > { %1304 = vmatpush1.bf16.msra.mxu0 %v2368_v34 }
 0x141   : > { %1305 = vmatprep.subr.bf16.mxu0 %v2375_v35 }
 0x144   : > { %1306 = vmatpush1.bf16.msra.mxu0 %v2373_v36 }
 0x147   : > { %1308 = vmatmul.mubr.bf16.vlgmr.msra.gmra.mrb[0].mxu0 %v1879_v37 }
 0x1a3   : > { %v1186_v45 = vpop.f32.mrb[0].mxu1 }
 0x1a4   : > { %v1188_v47 = vpop.f32.mrb[1].mxu1  ;;  %v1187_v57 = vadd.f32 %v1186_v45, %v477_v55 }
 0x1a5   : > { %v1190_v48 = vpop.f32.mrb[2].mxu1  ;;  %v1189_v58 = vadd.f32 %v1188_v47, %v481_v56 }
 0x1a6   : > { %v1191_v49 = vpop.f32.mrb[3].mxu1 }
 0x21a   : > { %v1309_v59 = vpop.f32.mrb[0].mxu0 }
 0x21b   : > { %v2086_v60 = vadd.f32 %v1309_v59, %v1187_v57  ;;  %v1311_v61 = vpop.f32.mrb[1].mxu0 }
 0x21c   : > { %v2088_v62 = vadd.f32 %v1311_v61, %v1189_v58  ;;  %v1313_v63 = vpop.f32.mrb[2].mxu0 }
 0x21d   : > { %v1316_v46 = vmax.f32 %v2086_v60, 0.0  ;;  %v1314_v0 = vpop.f32.mrb[3].mxu0 }
 0x21e   : > { %v1317_v1 = vmax.f32 %v2088_v62, 0.0 }
 0x21f   : > { %v1318_v4 = vpack.c.bf16 %v1316_v46, %v1316_v46 }
 0x220   : > { %v1319_v2 = vpack.c.bf16 %v1317_v1, %v1317_v1 }
 0x222   : > { %1556 = vmatprep.mubr.bf16.mxu1 %v1319_v2 }
 0x223   : > { %1557 = vmatmul.mubr.bf16.vlgmr.msra.gmra.mrb[4].mxu1 %v1318_v4 }
 0x224   : > { %2064 = vmatpush3.bf16.msra.mxu1 %v2427_v3 }
 0x225   : > { %2065 = vmatprep.subr.bf16.mxu1 %v2428_v5 }
 0x228   : > { %2066 = vmatpush3.bf16.msra.mxu1 %v2429_v6 }
 0x229   : > { %2067 = vmatprep.subr.bf16.mxu1 %v2430_v7 }
 0x22c   : > { %2068 = vmatpush3.bf16.msra.mxu1 %v2431_v8 }
 0x22d   : > { %2069 = vmatprep.subr.bf16.mxu1 %v2432_v9 }
 0x230   : > { %2070 = vmatpush3.bf16.msra.mxu1 %v2433_v10 }
 0x231   : > { %2071 = vmatprep.subr.bf16.mxu1 %v2434_v11 }
 0x234   : > { %2072 = vmatpush3.bf16.msra.mxu1 %v2435_v12 }
 0x235   : > { %2073 = vmatprep.subr.bf16.mxu1 %v2436_v13 }
 0x238   : > { %2074 = vmatpush3.bf16.msra.mxu1 %v2437_v14 }
 0x239   : > { %2075 = vmatprep.subr.bf16.mxu1 %v2438_v15 }
 0x23c   : > { %2076 = vmatpush3.bf16.msra.mxu1 %v2439_v16 }
 0x23d   : > { %2077 = vmatprep.subr.bf16.mxu1 %v2440_v17 }
 0x240   : > { %2078 = vmatpush3.bf16.msra.mxu1 %v2441_v18 }
 0x2f6   : > { %v1558_v22 = vpop.f32.mrb[4].mxu1 }
 0x2f7   : > { %v1559_v23 = vadd.f32 %v1558_v22, %v1357_v20  ;;  %v1560_v24 = vpop.f32.mrb[5].mxu1 }
 0x2f8   : > { %v1561_v25 = vadd.f32 %v1560_v24, %v1361_v21  ;;  %v1562_v26 = vpop.f32.mrb[6].mxu1 }
 0x2f9   : > { %v1565_v27 = vmax.f32 %v1559_v23, 0.0  ;;  %v1563_v28 = vpop.f32.mrb[7].mxu1 }
 0x2fa   : > { %v1566_v29 = vmax.f32 %v1561_v25, 0.0 }
 0x2fb   : > { %v1567_v31 = vpack.c.bf16 %v1565_v27, %v1565_v27 }
 0x2fc   : > { %v1568_v30 = vpack.c.bf16 %v1566_v29, %v1566_v29 }
 0x2fe   : > { %1736 = vmatprep.mubr.bf16.mxu1 %v1568_v30 }
 0x2ff   : > { %1737 = vmatmul.mubr.bf16.vlgmr.msra.gmra.mrb[8].mxu1 %v1567_v31 }
 0x3d2   : > { %v2079_v32 = vpop.f32.mrb[8].mxu1 }
 0x3d3   : > { %v2080_v34 = vpop.f32.mrb[9].mxu1 }
 0x3d4   : > { %v2081_v35 = vadd.f32 %v2080_v34, %v2079_v32  ;;  %v2082_v36 = vpop.f32.mrb[10].mxu1 }
 0x3d5   : > { %v2083_v37 = vpop.f32.mrb[11].mxu1 }
 0x3d6   : > { %v1739_v38 = vadd.f32 %v2081_v35, %v2041_v33 }
 0x3d8   : > { %1744 = vst [vmem:[%s338_s29] sm:$0xff] %v1739_v38 }
 0x3d9   : > { %2569 = shalt.err (!%p2566_p4)
}
 0x3da   : > { %s2570_s15 = scalar_lea.hbm %s2925_s21, 128  ;;  %s2574_s13 = scalar_lea.hbm %s2976_s7, 256 }
 0x3db   : > { %p2571_p0 = scmp.ne.s32.totalorder %s2925_s21, %s2570_s15  ;;  %p2575_p8 = scmp.lt.u32.totalorder %s2925_s21, %s2976_s7 }
 0x3dc   : > { %p2576_p13 = scmp.lt.u32.totalorder %s2574_s13, %s2570_s15  ;;  %p2578_p10 = scmp.lt.u32.totalorder %s2570_s15, %s2925_s21 }
 0x3dd   : > { %p2572_p9 = pnand %p2571_p0, %p2826_p5 }
 0x3de   : > { %p2577_p6 = por %p2576_p13, %p2575_p8 }
 0x3df   : > { %p2573_p11 = pneg %p2572_p9 }
 0x3e0   : > { %p2579_p3 = por %p2578_p10, %p2577_p6 }
 0x3e2   : > { %p2580_p7 = pnand %p2579_p3, %p2573_p11 }
 0x3e4   : > { %2583 = shalt.err (!%p2580_p7)
}
 0x3e5   : > { %2111 = dma.vmem_to_hbm [thread:$0]  (%p2826_p5), %s2927_s11, 128, %s2925_s21, %s1746_s16  }
 0x3e6 PF: > { %s2996_s29 = sld [smem:[#allocation15_spill]]  ;;  %s1771_s17 = sand.u32 1, %s2618_s24  }
 0x3e7   : > { %p2998_p2 = scmp.ge.s32.totalorder %s2630_s27, 2  ;;  %s1772_s18 = scalar_lea.sflag [#allocation4], %s1771_s17 }
 0x3ec   : > { %p2997_p12 = scmp.ne.s32.totalorder %s2996_s29, 0 }
 0x3ee   : > { %p2128_p1 = pnand %p2998_p2, %p2997_p12 }
 0x3f0   : > { %2613 = dma.done.wait (!%p2128_p1), %s1772_s18, 128  }
 0x3f1   : > { %2615 = vsyncadd (!%p2128_p1), %s1772_s18, 4294967168  ;;  %p22_p4 = scmp.ge.s32.totalorder %s2812_s8, 4   ;;  %s2999_s24 = smov %s2622_s25 }
 0x3f2   : > { %s3000_s25 = smov %s2626_s26  ;;  %s3001_s26 = smov %s2822_s19 }
 0x3f3   : > { %s3002_s27 = smov %s2812_s8  ;;  %24 = sbr.rel (!%p22_p4) target bundleno = 7 (0x7), region = 105 }
 0x3fa   :  { %1777 = vsyncpa [#allocation3], 1 }
 0x3fb   :  { %1779 = vsyncpa [#allocation3 + $0x1], 1 }
 0x3fc   :  { %1780 = vsyncpa [#allocation6], 1 }
 0x3fd   :  { %1781 = vsyncpa [#allocation9], 1 }
 0x3fe   :  { %1782 = vsyncpa [#allocation4], 1 }
 0x3ff   :  { %1784 = vsyncpa [#allocation4 + $0x1], 1 }

// kernel: tpu_custom_call.1
= control target key start
LH: loop header
LB: loop body
LE: loop exit
PB: predicated region body
PF: predicated region fallthrough
CT: control target
= control target key end

     0   :  { %12 = vsyncpa [#allocation3], 0  ;;  %s2969_s0 = inlined_call_operand.hbm [shape: bf16[16,1024], index: 0, kind: input, shape index: {}]   ;;  %s2970_s1 = inlined_call_operand.hbm [shape: bf16[1024,256], index: 1, kind: input, shape index: {}]   ;;  %s2971_s2 = inlined_call_operand.vmem [shape: f32[1,256], index: 2, kind: input, shape index: {}]   ;;  %s2972_s3 = inlined_call_operand.hbm [shape: bf16[256,256], index: 3, kind: input, shape index: {}]   ;;  %s2973_s4 = inlined_call_operand.vmem [shape: f32[1,256], index: 4, kind: input, shape index: {}]   ;;  %s2974_s5 = inlined_call_operand.hbm [shape: bf16[256,128], index: 5, kind: input, shape index: {}]   ;;  %s2975_s6 = inlined_call_operand.vmem [shape: f32[1,128], index: 6, kind: input, shape index: {}]   ;;  %s2976_s7 = inlined_call_operand.hbm [shape: f32[16,128], index: 7, kind: output, shape index: {}]  }
   0x1   :  { %14 = vsyncpa [#allocation3 + $0x1], 0 }
   0x2   :  { %15 = vsyncpa [#allocation6], 0 }
   0x3   :  { %16 = vsyncpa [#allocation9], 0 }
   0x4   :  { %17 = vsyncpa [#allocation4], 0 }
   0x5   :  { %19 = vsyncpa [#allocation4 + $0x1], 0  ;;  %s2681_s24 = smov 0   ;;  %s2683_s25 = smov 0  }
   0x6   :  { %s2685_s26 = smov 0   ;;  %s2687_s27 = smov 0  }
   0x7 LB: > { %s2702_s28 = sadd.s32 4294967295, %s2630_s27   ;;  %s1858_s29 = sadd.s32 4294967294, %s2630_s27   ;;  %s2630_s27 = sphi %s2687_s27, %s3002_s27   ;;  %s2626_s26 = sphi %s2685_s26, %s3001_s26   ;;  %s2622_s25 = sphi %s2683_s25, %s3000_s25   ;;  %s2618_s24 = sphi %s2681_s24, %s2999_s24  }
   0x8   : > { %p45_p0 = scmp.ne.s32.totalorder %s2622_s25, %s2618_s24  ;;  %p2977_p1 = scmp.eq.s32.totalorder %s2702_s28, 0 }
   0x9   : > { %p201_p3 = scmp.eq.s32.totalorder %s1858_s29, 1  ;;  %p1859_p5 = scmp.ge.s32.totalorder %s2630_s27, 1 }
   0xa   : > { %p2711_p4 = por %p2977_p1, %p45_p0  ;;  %p208_p7 = scmp.lt.s32.totalorder %s2630_s27, 3 }
   0xb   : > { %p2716_p6 = por %p201_p3, %p45_p0  ;;  %s2632_s10 = smov [#allocation5]  }
   0xc   : > { %s2981_s30 = scalar_select %p2711_p4, 1, 0 }
   0xd   : > { %s2982_s8 = scalar_select %p2716_p6, 1, 0 }
   0xe   : > { %p2721_p8 = pnand %p1859_p5, %p208_p7  ;;  %s220_s11 = sshll.u32 %s2632_s10, 4  ;;  %s2725_s11 = int_to_ptr.vmem [resolvable:$true] %s220_s11 }
   0xf   : > { %2983 = sst [smem:[#allocation15_spill]] %s2982_s8  ;;  %s2633_s13 = smov [#allocation7]  }
  0x10   : > { %s2984_s9 = scalar_select %p2721_p8, 1, 0 }
  0x11   : > { %p2113_p9 = pneg %p2721_p8  ;;  %s236_s14 = sshll.u32 %s2633_s13, 4  ;;  %s2736_s14 = int_to_ptr.vmem [resolvable:$true] %s236_s14 }
  0x12   : > { %s2634_s15 = smov [#allocation8]   ;;  %s2442_s19 = scalar_lea.hbm %s2970_s1, 16384 }
  0x13   : > { %p2732_p11 = pnand %p2113_p9, %p2977_p1  ;;  %s2738_s16 = sshll.u32 %s2634_s15, 4  ;;  %s253_s16 = int_to_ptr.vmem [resolvable:$true] %s2738_s16 }
  0x14   : > { %p2443_p12 = scmp.ne.s32.totalorder %s2970_s1, %s2442_s19  ;;  %p2449_p5 = scmp.lt.u32.totalorder %s2442_s19, %s2970_s1 }
  0x15   : > { %p2748_p13 = pneg %p2732_p11 }
  0x17   : > { %p2445_p0 = pnand %p2748_p13, %p2443_p12 }
  0x19   : > { %p2446_p3 = pneg %p2445_p0 }
  0x1b   : > { %p2451_p7 = pnand %p2449_p5, %p2446_p3 }
  0x1d   : > { %2454 = shalt.err (!%p2451_p7)
}
  0x1e   : > { %s2455_s10 = scalar_lea.vmem %s2725_s11, 16384  ;;  %p2463_p2 = scmp.lt.s32.totalorder %s2725_s11, %s2725_s11 }
  0x1f   : > { %p2456_p9 = scmp.ne.s32.totalorder %s2725_s11, %s2455_s10  ;;  %p2464_p6 = scmp.lt.s32.totalorder %s2455_s10, %s2455_s10 }
  0x21   : > { %p2458_p10 = pnand %p2456_p9, %p2748_p13  ;;  %p2465_p12 = por %p2464_p6, %p2463_p2 }
  0x23   : > { %p2459_p1 = pneg %p2458_p10 }
  0x25   : > { %p2466_p0 = pnand %p2465_p12, %p2459_p1 }
  0x27   : > { %2469 = shalt.err (!%p2466_p0)
}
  0x28   : > { %s2635_s13 = smov 128   ;;  %s2636_s15 = smov 8  }
  0x29   : > { %2116 = dma.hbm_to_vmem [thread:$0]  (!%p2732_p11), %s2970_s1, 16384, %s2725_s11, [#allocation6], %s2635_s13, %s2635_s13, %s2636_s15  }
  0x2a   : > { %s2470_s21 = scalar_lea.hbm %s2972_s3, 4096 }
  0x2b   : > { %p2471_p2 = scmp.ne.s32.totalorder %s2972_s3, %s2470_s21  ;;  %p2477_p10 = scmp.lt.u32.totalorder %s2470_s21, %s2972_s3 }
  0x2d   : > { %p2473_p1 = pnand %p2471_p2, %p2748_p13 }
  0x2f   : > { %p2474_p6 = pneg %p2473_p1 }
  0x31   : > { %p2479_p3 = pnand %p2477_p10, %p2474_p6 }
  0x33   : > { %2482 = shalt.err (!%p2479_p3)
}
  0x34   : > { %s2483_s11 = scalar_lea.vmem %s2736_s14, 4096  ;;  %p2491_p12 = scmp.lt.s32.totalorder %s2736_s14, %s2736_s14 }
  0x35   : > { %p2484_p5 = scmp.ne.s32.totalorder %s2736_s14, %s2483_s11  ;;  %p2492_p0 = scmp.lt.s32.totalorder %s2483_s11, %s2483_s11 }
  0x37   : > { %p2486_p7 = pnand %p2484_p5, %p2748_p13  ;;  %p2493_p2 = por %p2492_p0, %p2491_p12 }
  0x39   : > { %p2487_p9 = pneg %p2486_p7 }
  0x3b   : > { %p2494_p1 = pnand %p2493_p2, %p2487_p9 }
  0x3d   : > { %2497 = shalt.err (!%p2494_p1)
}
  0x3e   : > { %2119 = dma.hbm_to_vmem [thread:$0]  (!%p2732_p11), %s2972_s3, 4096, %s2736_s14, [#allocation6], %s2635_s13, %s2635_s13, %s2636_s15  }
  0x3f   : > { %s2498_s20 = scalar_lea.hbm %s2974_s5, 2048 }
  0x40   : > { %p2499_p6 = scmp.ne.s32.totalorder %s2974_s5, %s2498_s20  ;;  %p2505_p5 = scmp.lt.u32.totalorder %s2498_s20, %s2974_s5 }
  0x42   : > { %p2501_p10 = pnand %p2499_p6, %p2748_p13 }
  0x44   : > { %p2502_p3 = pneg %p2501_p10 }
  0x46   : > { %p2507_p7 = pnand %p2505_p5, %p2502_p3 }
  0x48   : > { %2510 = shalt.err (!%p2507_p7)
}
  0x49   : > { %s2511_s11 = scalar_lea.vmem %s253_s16, 2048  ;;  %p2519_p2 = scmp.lt.s32.totalorder %s253_s16, %s253_s16 }
  0x4a   : > { %p2512_p9 = scmp.ne.s32.totalorder %s253_s16, %s2511_s11  ;;  %p2520_p1 = scmp.lt.s32.totalorder %s2511_s11, %s2511_s11 }
  0x4c   : > { %p2514_p12 = pnand %p2512_p9, %p2748_p13  ;;  %p2521_p4 = por %p2520_p1, %p2519_p2 }
  0x4e   : > { %p2515_p0 = pneg %p2514_p12 }
  0x50   : > { %p2522_p8 = pnand %p2521_p4, %p2515_p0 }
  0x52   : > { %2525 = shalt.err (!%p2522_p8)
}
  0x53   : > { %s2637_s14 = smov 64   ;;  %s2638_s22 = smov 4  }
  0x54   : > { %2122 = dma.hbm_to_vmem [thread:$0]  (!%p2732_p11), %s2974_s5, 2048, %s253_s16, [#allocation9], %s2637_s14, %s2637_s14, %s2638_s22  }
  0x55   : > { %s2812_s8 = sadd.s32 1, %s2630_s27   ;;  %s32_s18 = sadd.s32 1, %s2626_s26 }
  0x56   : > { %s29_s17 = ssub.s32 %s2630_s27, %s2812_s8  ;;  %p39_p8 = scmp.ne.s32.totalorder %s2626_s26, %s2622_s25 }
  0x57   : > { %p30_p4 = scmp.eq.s32.totalorder %s29_s17, 0  ;;  %p40_p13 = scmp.eq.s32.totalorder %s2630_s27, 0 }
  0x58   : > { %p2134_p6 = scmp.lt.s32.totalorder %s2630_s27, 2  ;;  %p2987_p3 = scmp.eq.s32.totalorder %s2702_s28, 1 }
  0x59   : > { %s2822_s19 = scalar_select %p30_p4, %s2626_s26, %s32_s18  }
  0x5a   : > { %p41_p10 = por %p40_p13, %p39_p8  ;;  %p2826_p5 = por %p2987_p3, %p39_p8 }
  0x5b   : > { %s269_s12 = sand.u32 1, %s2626_s26   ;;  %s2062_s21 = sshll.u32 %s2630_s27, 9 }
  0x5c   : > { %s1864_s16 = sshll.u32 %s269_s12, 5  ;;  %s2835_s10 = scalar_lea.hbm %s2969_s0, %s2062_s21 }
  0x5d   : > { %s273_s11 = scalar_lea.vmem [#allocation2], %s1864_s16  ;;  %p2837_p11 = pnand %p2134_p6, %p41_p10 }
  0x5e   : > { %s281_s14 = sshll.u32 %s273_s11, 4  ;;  %s270_s13 = scalar_lea.sflag [#allocation3], %s269_s12  ;;  %s2841_s14 = int_to_ptr.vmem [resolvable:$true] %s281_s14 }
  0x5f   : > { %s2526_s15 = scalar_lea.hbm %s2835_s10, 512  ;;  %p2528_p9 = pneg %p2837_p11 }
  0x60   : > { %p2527_p7 = scmp.ne.s32.totalorder %s2835_s10, %s2526_s15  ;;  %s2531_s21 = scalar_lea.hbm %s2969_s0, 1024 }
  0x61   : > { %p2532_p2 = scmp.lt.u32.totalorder %s2835_s10, %s2969_s0  ;;  %p2533_p1 = scmp.lt.u32.totalorder %s2531_s21, %s2526_s15 }
  0x62   : > { %p2529_p12 = pnand %p2528_p9, %p2527_p7  ;;  %p2535_p8 = scmp.lt.u32.totalorder %s2526_s15, %s2835_s10 }
  0x63   : > { %p2534_p4 = por %p2533_p1, %p2532_p2 }
  0x64   : > { %p2530_p0 = pneg %p2529_p12 }
  0x65   : > { %p2536_p13 = por %p2535_p8, %p2534_p4 }
  0x67   : > { %p2537_p6 = pnand %p2536_p13, %p2530_p0 }
  0x69   : > { %2540 = shalt.err (!%p2537_p6)
}
  0x6a   : > { %s2541_s12 = scalar_lea.vmem %s2841_s14, 512  ;;  %s2639_s29 = smov [#allocation2]  }
  0x6b   : > { %p2542_p10 = scmp.ne.s32.totalorder %s2841_s14, %s2541_s12  ;;  %s2546_s11 = sshll.u32 %s2639_s29, 4  ;;  %s2547_s11 = int_to_ptr.vmem [resolvable:$false] %s2546_s11 }
  0x6c   : > { %s2548_s17 = scalar_lea.vmem %s2547_s11, 1024  ;;  %p2549_p12 = scmp.lt.s32.totalorder %s2841_s14, %s2547_s11 }
  0x6d   : > { %p2544_p3 = pnand %p2542_p10, %p2528_p9  ;;  %p2550_p2 = scmp.lt.s32.totalorder %s2548_s17, %s2541_s12 }
  0x6f   : > { %p2545_p7 = pneg %p2544_p3  ;;  %p2551_p1 = por %p2550_p2, %p2549_p12 }
  0x71   : > { %p2552_p4 = pnand %p2551_p1, %p2545_p7 }
  0x73   : > { %2555 = shalt.err (!%p2552_p4)
}
  0x74   : > { %2126 = dma.hbm_to_vmem [thread:$0]  (!%p2837_p11), %s2835_s10, 512, %s2841_s14, %s270_s13  }
  0x75   : > { %p2990_p0 = scmp.ne.s32.totalorder %s2984_s9, 0 }
  0x76   : > { %s2871_s15 = sand.u32 (!%p2990_p0), 1, %s2622_s25   ;;  %p2991_p9 = scmp.ne.s32.totalorder (!%p2990_p0), %s2981_s30, 0 }
  0x77   : > { %290 = sbr.rel (%p2990_p0) target bundleno = 998 (0x3e6), region = 48  ;;  %s1868_s18 = sshll.u32 (!%p2990_p0), %s2871_s15, 5 }
  0x78   : > { %s293_s21 = scalar_lea.sflag (!%p2990_p0), [#allocation3], %s2871_s15  ;;  %s2875_s16 = scalar_lea.vmem (!%p2990_p0), [#allocation2], %s1868_s18 }
  0x7e   : > { %2601 = dma.done.wait (%p2991_p9), %s293_s21, 512  }
  0x7f   : > { %2603 = vsyncadd (%p2991_p9), %s293_s21, 4294966784  ;;  %p2992_p11 = scmp.eq.s32.totalorder %s2702_s28, 0 }
  0x81   : > { %2605 = dma.done.wait (%p2992_p11), [#allocation6], 20480   ;;  %p2993_p8 = pmov %p2992_p11 }
  0x83   : > { %2607 = vsyncadd (%p2993_p8), [#allocation6], 4294946816  ;;  %p2994_p13 = pmov %p2993_p8 }
  0x84   : > { %p2995_p6 = pmov %p2993_p8 }
  0x85   : > { %2609 = dma.done.wait (%p2994_p13), [#allocation9], 2048  }
  0x86   : > { %2611 = vsyncadd (%p2995_p6), [#allocation9], 4294965248  ;;  %v2178_v0 = vld [vmem:[#allocation5 + $0x104] ss:$8 sps:$4 sm:$0xff]   ;;  %v2180_v1 = vld [vmem:[#allocation5 + $0x100] ss:$8 sps:$4 sm:$0xff]  }
  0x87   : > { %1193 = vmatprep.subr.bf16.mxu0 %v2178_v0  ;;  %v2181_v2 = vld [vmem:[#allocation5 + $0x114] ss:$8 sps:$4 sm:$0xff]   ;;  %v2183_v3 = vld [vmem:[#allocation5 + $0x110] ss:$8 sps:$4 sm:$0xff]   ;;  %v2184_v4 = vld [vmem:[#allocation5 + $0x124] ss:$8 sps:$4 sm:$0xff]  }
  0x88   : > { %1194 = vmatpush1.bf16.msra.mxu0 %v2180_v1  ;;  %v2186_v5 = vld [vmem:[#allocation5 + $0x120] ss:$8 sps:$4 sm:$0xff]   ;;  %v2187_v6 = vld [vmem:[#allocation5 + $0x134] ss:$8 sps:$4 sm:$0xff]   ;;  %v2189_v7 = vld [vmem:[#allocation5 + $0x130] ss:$8 sps:$4 sm:$0xff]  }
  0x89   : > { %1195 = vmatprep.subr.bf16.mxu0 %v2181_v2  ;;  %v2190_v8 = vld [vmem:[#allocation5 + $0x144] ss:$8 sps:$4 sm:$0xff]   ;;  %v2192_v9 = vld [vmem:[#allocation5 + $0x140] ss:$8 sps:$4 sm:$0xff]   ;;  %v2193_v10 = vld [vmem:[#allocation5 + $0x154] ss:$8 sps:$4 sm:$0xff]  }
  0x8a   : > { %v2195_v11 = vld [vmem:[#allocation5 + $0x150] ss:$8 sps:$4 sm:$0xff]   ;;  %v2196_v12 = vld [vmem:[#allocation5 + $0x164] ss:$8 sps:$4 sm:$0xff]   ;;  %v2198_v15 = vld [vmem:[#allocation5 + $0x160] ss:$8 sps:$4 sm:$0xff]  }
  0x8b   : > { %v2890_v13 = vld [vmem:[%s2875_s16 + $0x8] sm:$0xff]  ;;  %v2199_v16 = vld [vmem:[#allocation5 + $0x174] ss:$8 sps:$4 sm:$0xff]   ;;  %v2201_v17 = vld [vmem:[#allocation5 + $0x170] ss:$8 sps:$4 sm:$0xff]   ;;  %s1872_s22 = sshll.u32 %s2871_s15, 3 }
  0x8c   : > { %1196 = vmatpush1.bf16.msra.mxu0 %v2183_v3  ;;  %v1876_v14 = vcombine.high %v2890_v13, %v2890_v13  ;;  %v2202_v18 = vld [vmem:[#allocation5 + $0x184] ss:$8 sps:$4 sm:$0xff]   ;;  %v2204_v19 = vld [vmem:[#allocation5 + $0x180] ss:$8 sps:$4 sm:$0xff]   ;;  %v2205_v20 = vld [vmem:[#allocation5 + $0x194] ss:$8 sps:$4 sm:$0xff]   ;;  %v1875_v48 = vcombine.low %v2890_v13, %v2890_v13 }
  0x8d   : > { %1197 = vmatprep.subr.bf16.mxu0 %v2184_v4  ;;  %v2207_v21 = vld [vmem:[#allocation5 + $0x190] ss:$8 sps:$4 sm:$0xff]   ;;  %v2208_v22 = vld [vmem:[#allocation5 + $0x1a4] ss:$8 sps:$4 sm:$0xff]   ;;  %v2210_v23 = vld [vmem:[#allocation5 + $0x1a0] ss:$8 sps:$4 sm:$0xff]  }
  0x8e   : > { %1225 = vmatprep.mubr.bf16.mxu0 %v1876_v14  ;;  %v2211_v24 = vld [vmem:[#allocation5 + $0x1b4] ss:$8 sps:$4 sm:$0xff]   ;;  %v2273_v25 = vld [vmem:[#allocation5 + $0x4] ss:$8 sps:$4 sm:$0xff]   ;;  %v2275_v26 = vld [vmem:[#allocation5] ss:$8 sps:$4 sm:$0xff]  }
  0x8f   : > { %v2213_v27 = vld [vmem:[#allocation5 + $0x1b0] ss:$8 sps:$4 sm:$0xff]   ;;  %v2214_v28 = vld [vmem:[#allocation5 + $0x1c4] ss:$8 sps:$4 sm:$0xff]   ;;  %1152 = vmatprep.subr.bf16.mxu1 %v2273_v25  ;;  %v2279_v29 = vld [vmem:[#allocation5 + $0x14] ss:$8 sps:$4 sm:$0xff]  }
  0x90   : > { %1198 = vmatpush1.bf16.msra.mxu0 %v2186_v5  ;;  %1153 = vmatpush1.bf16.msra.mxu1 %v2275_v26  ;;  %v2281_v30 = vld [vmem:[#allocation5 + $0x10] ss:$8 sps:$4 sm:$0xff]   ;;  %v2216_v31 = vld [vmem:[#allocation5 + $0x1c0] ss:$8 sps:$4 sm:$0xff]   ;;  %v2217_v32 = vld [vmem:[#allocation5 + $0x1d4] ss:$8 sps:$4 sm:$0xff]  }
  0x91   : > { %1199 = vmatprep.subr.bf16.mxu0 %v2187_v6  ;;  %1154 = vmatprep.subr.bf16.mxu1 %v2279_v29  ;;  %v2287_v33 = vld [vmem:[#allocation5 + $0x24] ss:$8 sps:$4 sm:$0xff]   ;;  %v2289_v34 = vld [vmem:[#allocation5 + $0x20] ss:$8 sps:$4 sm:$0xff]   ;;  %v2293_v35 = vld [vmem:[#allocation5 + $0x34] ss:$8 sps:$4 sm:$0xff]  }
  0x92   : > { %v2219_v36 = vld [vmem:[#allocation5 + $0x1d0] ss:$8 sps:$4 sm:$0xff]   ;;  %v2220_v37 = vld [vmem:[#allocation5 + $0x1e4] ss:$8 sps:$4 sm:$0xff]   ;;  %v2222_v40 = vld [vmem:[#allocation5 + $0x1e0] ss:$8 sps:$4 sm:$0xff]  }
  0x93   : > { %v2295_v38 = vld [vmem:[#allocation5 + $0x30] ss:$8 sps:$4 sm:$0xff]   ;;  %v2299_v39 = vld [vmem:[#allocation5 + $0x44] ss:$8 sps:$4 sm:$0xff]   ;;  %v2223_v41 = vld [vmem:[#allocation5 + $0x1f4] ss:$8 sps:$4 sm:$0xff]  }
  0x94   : > { %1200 = vmatpush1.bf16.msra.mxu0 %v2189_v7  ;;  %1155 = vmatpush1.bf16.msra.mxu1 %v2281_v30  ;;  %v2301_v42 = vld [vmem:[#allocation5 + $0x40] ss:$8 sps:$4 sm:$0xff]   ;;  %v2305_v43 = vld [vmem:[#allocation5 + $0x54] ss:$8 sps:$4 sm:$0xff]   ;;  %v2225_v44 = vld [vmem:[#allocation5 + $0x1f0] ss:$8 sps:$4 sm:$0xff]  }
  0x95   : > { %1201 = vmatprep.subr.bf16.mxu0 %v2190_v8  ;;  %1156 = vmatprep.subr.bf16.mxu1 %v2287_v33  ;;  %v2230_v45 = vld [vmem:[#allocation5 + $0x204] ss:$8 sps:$4 sm:$0xff]   ;;  %v2895_v46 = vld [vmem:[%s2875_s16 + $0x10] sm:$0xff]  ;;  %v2228_v50 = vld [vmem:[#allocation5 + $0x200] ss:$8 sps:$4 sm:$0xff]   ;;  %s2059_s12 = sshll.u32 %s2702_s28, 7 }
  0x96   : > { %v2307_v47 = vld [vmem:[#allocation5 + $0x50] ss:$8 sps:$4 sm:$0xff]   ;;  %v2311_v49 = vld [vmem:[#allocation5 + $0x64] ss:$8 sps:$4 sm:$0xff]   ;;  %v1878_v51 = vcombine.high %v2895_v46, %v2895_v46  ;;  %v2233_v52 = vld [vmem:[#allocation5 + $0x214] ss:$8 sps:$4 sm:$0xff]   ;;  %s2925_s21 = scalar_lea.hbm %s2976_s7, %s2059_s12 }
  0x97   : > { %v2313_v53 = vld [vmem:[#allocation5 + $0x60] ss:$8 sps:$4 sm:$0xff]   ;;  %v2317_v54 = vld [vmem:[#allocation5 + $0x74] ss:$8 sps:$4 sm:$0xff]   ;;  %v2231_v55 = vld [vmem:[#allocation5 + $0x210] ss:$8 sps:$4 sm:$0xff]  }
  0x98   : > { %1202 = vmatpush1.bf16.msra.mxu0 %v2192_v9  ;;  %1157 = vmatpush1.bf16.msra.mxu1 %v2289_v34  ;;  %v2236_v56 = vld [vmem:[#allocation5 + $0x224] ss:$8 sps:$4 sm:$0xff]   ;;  %v2319_v57 = vld [vmem:[#allocation5 + $0x70] ss:$8 sps:$4 sm:$0xff]   ;;  %v2234_v59 = vld [vmem:[#allocation5 + $0x220] ss:$8 sps:$4 sm:$0xff]  }
  0x99   : > { %1203 = vmatprep.subr.bf16.mxu0 %v2193_v10  ;;  %1158 = vmatprep.subr.bf16.mxu1 %v2293_v35  ;;  %v2323_v58 = vld [vmem:[#allocation5 + $0x84] ss:$8 sps:$4 sm:$0xff]   ;;  %v2239_v60 = vld [vmem:[#allocation5 + $0x234] ss:$8 sps:$4 sm:$0xff]   ;;  %v2325_v61 = vld [vmem:[#allocation5 + $0x80] ss:$8 sps:$4 sm:$0xff]  }
  0x9a   : > { %v2329_v62 = vld [vmem:[#allocation5 + $0x94] ss:$8 sps:$4 sm:$0xff]   ;;  %v2237_v63 = vld [vmem:[#allocation5 + $0x230] ss:$8 sps:$4 sm:$0xff]   ;;  %v2242_v0 = vld [vmem:[#allocation5 + $0x244] ss:$8 sps:$4 sm:$0xff]  }
  0x9b   : > { %v2331_v1 = vld [vmem:[#allocation5 + $0x90] ss:$8 sps:$4 sm:$0xff]   ;;  %v2335_v2 = vld [vmem:[#allocation5 + $0xa4] ss:$8 sps:$4 sm:$0xff]   ;;  %v2240_v3 = vld [vmem:[#allocation5 + $0x240] ss:$8 sps:$4 sm:$0xff]  }
  0x9c   : > { %1204 = vmatpush1.bf16.msra.mxu0 %v2195_v11  ;;  %1159 = vmatpush1.bf16.msra.mxu1 %v2295_v38  ;;  %v2245_v4 = vld [vmem:[#allocation5 + $0x254] ss:$8 sps:$4 sm:$0xff]   ;;  %v2337_v5 = vld [vmem:[#allocation5 + $0xa0] ss:$8 sps:$4 sm:$0xff]   ;;  %v2243_v7 = vld [vmem:[#allocation5 + $0x250] ss:$8 sps:$4 sm:$0xff]  }
  0x9d   : > { %1205 = vmatprep.subr.bf16.mxu0 %v2196_v12  ;;  %1160 = vmatprep.subr.bf16.mxu1 %v2299_v39  ;;  %v2341_v6 = vld [vmem:[#allocation5 + $0xb4] ss:$8 sps:$4 sm:$0xff]   ;;  %v2248_v8 = vld [vmem:[#allocation5 + $0x264] ss:$8 sps:$4 sm:$0xff]   ;;  %v2343_v10 = vld [vmem:[#allocation5 + $0xb0] ss:$8 sps:$4 sm:$0xff]  }
  0x9e   : > { %v340_v9 = vld [vmem:[%s2875_s16] sm:$0xff]  ;;  %v2251_v14 = vld [vmem:[#allocation5 + $0x274] ss:$8 sps:$4 sm:$0xff]   ;;  %v2255_v25 = vld [vmem:[#allocation5 + $0x290] ss:$8 sps:$4 sm:$0xff]   ;;  %s338_s29 = scalar_lea.vmem [#allocation10], %s1872_s22 }
  0x9f   : > { %v1874_v11 = vcombine.high %v340_v9, %v340_v9  ;;  %v2347_v12 = vld [vmem:[#allocation5 + $0xc4] ss:$8 sps:$4 sm:$0xff]   ;;  %v2246_v13 = vld [vmem:[#allocation5 + $0x260] ss:$8 sps:$4 sm:$0xff]   ;;  %v2263_v30 = vld [vmem:[#allocation5 + $0x2b4] ss:$8 sps:$4 sm:$0xff]  }
  0xa0   : > { %1206 = vmatpush1.bf16.msra.mxu0 %v2198_v15  ;;  %1161 = vmatpush1.bf16.msra.mxu1 %v2301_v42  ;;  %v2349_v15 = vld [vmem:[#allocation5 + $0xc0] ss:$8 sps:$4 sm:$0xff]   ;;  %v2260_v26 = vld [vmem:[#allocation5 + $0x2a4] ss:$8 sps:$4 sm:$0xff]   ;;  %v2383_v33 = vld [vmem:[#allocation7 + $0x14] ss:$8 sps:$4 sm:$0xff]  }
  0xa1   : > { %1207 = vmatprep.subr.bf16.mxu0 %v2199_v16  ;;  %1162 = vmatprep.subr.bf16.mxu1 %v2305_v43  ;;  %v2353_v16 = vld [vmem:[#allocation5 + $0xd4] ss:$8 sps:$4 sm:$0xff]   ;;  %v2380_v29 = vld [vmem:[#allocation7 + $0x4] ss:$8 sps:$4 sm:$0xff]   ;;  %v2261_v34 = vld [vmem:[#allocation5 + $0x2b0] ss:$8 sps:$4 sm:$0xff]  }
  0xa2   : > { %1184 = vmatprep.mubr.bf16.mxu1 %v1874_v11  ;;  %v2266_v35 = vld [vmem:[#allocation5 + $0x2c4] ss:$8 sps:$4 sm:$0xff]   ;;  %v2264_v38 = vld [vmem:[#allocation5 + $0x2c0] ss:$8 sps:$4 sm:$0xff]   ;;  %v2269_v39 = vld [vmem:[#allocation5 + $0x2d4] ss:$8 sps:$4 sm:$0xff]  }
  0xa3   : > { %v2267_v42 = vld [vmem:[#allocation5 + $0x2d0] ss:$8 sps:$4 sm:$0xff]   ;;  %v2272_v43 = vld [vmem:[#allocation5 + $0x2e4] ss:$8 sps:$4 sm:$0xff]   ;;  %v2408_v11 = vld [vmem:[#allocation7 + $0xa0] ss:$8 sps:$4 sm:$0xff]  }
  0xa4   : > { %1208 = vmatpush1.bf16.msra.mxu0 %v2201_v17  ;;  %1163 = vmatpush1.bf16.msra.mxu1 %v2307_v47  ;;  %v2249_v17 = vld [vmem:[#allocation5 + $0x270] ss:$8 sps:$4 sm:$0xff]   ;;  %v2270_v47 = vld [vmem:[#allocation5 + $0x2e0] ss:$8 sps:$4 sm:$0xff]   ;;  %s1759_s11 = sshll.u32 %s338_s29, 4  ;;  %s2640_s28 = smov [#allocation10]   ;;  %s2927_s11 = int_to_ptr.vmem [resolvable:$true] %s1759_s11 }
  0xa5   : > { %1209 = vmatprep.subr.bf16.mxu0 %v2202_v18  ;;  %1164 = vmatprep.subr.bf16.mxu1 %v2311_v49  ;;  %v2254_v18 = vld [vmem:[#allocation5 + $0x284] ss:$8 sps:$4 sm:$0xff]   ;;  %v2390_v49 = vld [vmem:[#allocation7 + $0x40] ss:$8 sps:$4 sm:$0xff]   ;;  %s2556_s30 = scalar_lea.vmem %s2927_s11, 128  ;;  %s2560_s9 = sshll.u32 %s2640_s28, 4  ;;  %s2561_s9 = int_to_ptr.vmem [resolvable:$false] %s2560_s9 }
  0xa6   : > { %p2557_p10 = scmp.ne.s32.totalorder %s2927_s11, %s2556_s30  ;;  %s2562_s10 = scalar_lea.vmem %s2561_s9, 256 }
  0xa7   : > { %p2563_p12 = scmp.lt.s32.totalorder %s2927_s11, %s2561_s9  ;;  %p2564_p2 = scmp.lt.s32.totalorder %s2562_s10, %s2556_s30 }
  0xa8   : > { %1210 = vmatpush1.bf16.msra.mxu0 %v2204_v19  ;;  %1165 = vmatpush1.bf16.msra.mxu1 %v2313_v53  ;;  %v2355_v19 = vld [vmem:[#allocation5 + $0xd0] ss:$8 sps:$4 sm:$0xff]   ;;  %p2558_p3 = pnand %p2557_p10, %p2826_p5 }
  0xa9   : > { %1211 = vmatprep.subr.bf16.mxu0 %v2205_v20  ;;  %1166 = vmatprep.subr.bf16.mxu1 %v2317_v54  ;;  %v2359_v20 = vld [vmem:[#allocation5 + $0xe4] ss:$8 sps:$4 sm:$0xff]   ;;  %v2903_v53 = vld [vmem:[%s2875_s16 + $0x18] sm:$0xff]  ;;  %s1746_s16 = scalar_lea.sflag [#allocation4], %s2871_s15  ;;  %p2565_p1 = por %p2564_p2, %p2563_p12 }
  0xaa   : > { %v2393_v54 = vld [vmem:[#allocation7 + $0x50] ss:$8 sps:$4 sm:$0xff]   ;;  %p2559_p7 = pneg %p2558_p3 }
  0xac   : > { %1212 = vmatpush1.bf16.msra.mxu0 %v2207_v21  ;;  %1167 = vmatpush1.bf16.msra.mxu1 %v2319_v57  ;;  %v2252_v21 = vld [vmem:[#allocation5 + $0x280] ss:$8 sps:$4 sm:$0xff]   ;;  %p2566_p4 = pnand %p2565_p1, %p2559_p7 }
  0xad   : > { %1213 = vmatprep.subr.bf16.mxu0 %v2208_v22  ;;  %1168 = vmatprep.subr.bf16.mxu1 %v2323_v58  ;;  %v2257_v22 = vld [vmem:[#allocation5 + $0x294] ss:$8 sps:$4 sm:$0xff]   ;;  %v2284_v57 = vld [vmem:[#allocation5 + $0x300] ss:$8 sps:$4 sm:$0xff]   ;;  %v1880_v58 = vcombine.high %v2903_v53, %v2903_v53 }
  0xb0   : > { %1214 = vmatpush1.bf16.msra.mxu0 %v2210_v23  ;;  %1169 = vmatpush1.bf16.msra.mxu1 %v2325_v61  ;;  %v2361_v23 = vld [vmem:[#allocation5 + $0xe0] ss:$8 sps:$4 sm:$0xff]   ;;  %v2401_v61 = vld [vmem:[#allocation7 + $0x74] ss:$8 sps:$4 sm:$0xff]  }
  0xb1   : > { %1215 = vmatprep.subr.bf16.mxu0 %v2211_v24  ;;  %1170 = vmatprep.subr.bf16.mxu1 %v2329_v62  ;;  %v2365_v24 = vld [vmem:[#allocation5 + $0xf4] ss:$8 sps:$4 sm:$0xff]   ;;  %v2290_v62 = vld [vmem:[#allocation5 + $0x310] ss:$8 sps:$4 sm:$0xff]  }
  0xb4   : > { %1216 = vmatpush1.bf16.msra.mxu0 %v2213_v27  ;;  %1171 = vmatpush1.bf16.msra.mxu1 %v2331_v1  ;;  %v2367_v27 = vld [vmem:[#allocation5 + $0xf0] ss:$8 sps:$4 sm:$0xff]   ;;  %v2296_v1 = vld [vmem:[#allocation5 + $0x320] ss:$8 sps:$4 sm:$0xff]  }
  0xb5   : > { %1217 = vmatprep.subr.bf16.mxu0 %v2214_v28  ;;  %1172 = vmatprep.subr.bf16.mxu1 %v2335_v2  ;;  %v2258_v28 = vld [vmem:[#allocation5 + $0x2a0] ss:$8 sps:$4 sm:$0xff]   ;;  %v2304_v2 = vld [vmem:[#allocation5 + $0x334] ss:$8 sps:$4 sm:$0xff]  }
  0xb8   : > { %1218 = vmatpush1.bf16.msra.mxu0 %v2216_v31  ;;  %1173 = vmatpush1.bf16.msra.mxu1 %v2337_v5  ;;  %v2378_v31 = vld [vmem:[#allocation7] ss:$8 sps:$4 sm:$0xff]   ;;  %v2302_v5 = vld [vmem:[#allocation5 + $0x330] ss:$8 sps:$4 sm:$0xff]  }
  0xb9   : > { %1219 = vmatprep.subr.bf16.mxu0 %v2217_v32  ;;  %1174 = vmatprep.subr.bf16.mxu1 %v2341_v6  ;;  %v1873_v32 = vcombine.low %v340_v9, %v340_v9  ;;  %v2310_v6 = vld [vmem:[#allocation5 + $0x344] ss:$8 sps:$4 sm:$0xff]   ;;  %v2308_v9 = vld [vmem:[#allocation5 + $0x340] ss:$8 sps:$4 sm:$0xff]  }
  0xbc   : > { %1220 = vmatpush1.bf16.msra.mxu0 %v2219_v36  ;;  %1175 = vmatpush1.bf16.msra.mxu1 %v2343_v10  ;;  %v2381_v36 = vld [vmem:[#allocation7 + $0x10] ss:$8 sps:$4 sm:$0xff]   ;;  %v2316_v10 = vld [vmem:[#allocation5 + $0x354] ss:$8 sps:$4 sm:$0xff]  }
  0xbd   : > { %1221 = vmatprep.subr.bf16.mxu0 %v2220_v37  ;;  %1176 = vmatprep.subr.bf16.mxu1 %v2347_v12  ;;  %v2386_v37 = vld [vmem:[#allocation7 + $0x24] ss:$8 sps:$4 sm:$0xff]   ;;  %v2413_v12 = vld [vmem:[#allocation7 + $0xb4] ss:$8 sps:$4 sm:$0xff]  }
  0xc0   : > { %1222 = vmatpush1.bf16.msra.mxu0 %v2222_v40  ;;  %1177 = vmatpush1.bf16.msra.mxu1 %v2349_v15  ;;  %v2384_v40 = vld [vmem:[#allocation7 + $0x20] ss:$8 sps:$4 sm:$0xff]   ;;  %v2411_v15 = vld [vmem:[#allocation7 + $0xb0] ss:$8 sps:$4 sm:$0xff]  }
  0xc1   : > { %1223 = vmatprep.subr.bf16.mxu0 %v2223_v41  ;;  %1178 = vmatprep.subr.bf16.mxu1 %v2353_v16  ;;  %v2389_v41 = vld [vmem:[#allocation7 + $0x34] ss:$8 sps:$4 sm:$0xff]   ;;  %v2416_v16 = vld [vmem:[#allocation7 + $0xc4] ss:$8 sps:$4 sm:$0xff]  }
  0xc4   : > { %1224 = vmatpush1.bf16.msra.mxu0 %v2225_v44  ;;  %1179 = vmatpush1.bf16.msra.mxu1 %v2355_v19  ;;  %v2387_v44 = vld [vmem:[#allocation7 + $0x30] ss:$8 sps:$4 sm:$0xff]   ;;  %v2414_v19 = vld [vmem:[#allocation7 + $0xc0] ss:$8 sps:$4 sm:$0xff]  }
  0xc5   : > { %1234 = vmatprep.subr.bf16.mxu0 %v2230_v45  ;;  %1180 = vmatprep.subr.bf16.mxu1 %v2359_v20  ;;  %v2392_v45 = vld [vmem:[#allocation7 + $0x44] ss:$8 sps:$4 sm:$0xff]   ;;  %v2326_v20 = vld [vmem:[#allocation5 + $0x370] ss:$8 sps:$4 sm:$0xff]  }
  0xc7   : > { %1226 = vmatmul.mubr.bf16.vlgmr.msra.gmra.mrb[0].mxu0 %v1875_v48  ;;  %v2278_v48 = vld [vmem:[#allocation5 + $0x2f4] ss:$8 sps:$4 sm:$0xff]  }
  0xc8   : > { %1235 = vmatpush1.bf16.msra.mxu0 %v2228_v50  ;;  %1266 = vmatprep.mubr.bf16.mxu0 %v1878_v51  ;;  %v2395_v50 = vld [vmem:[#allocation7 + $0x54] ss:$8 sps:$4 sm:$0xff]   ;;  %v2276_v51 = vld [vmem:[#allocation5 + $0x2f0] ss:$8 sps:$4 sm:$0xff]  }
  0xc9   : > { %1236 = vmatprep.subr.bf16.mxu0 %v2233_v52  ;;  %1181 = vmatpush1.bf16.msra.mxu1 %v2361_v23  ;;  %v2286_v52 = vld [vmem:[#allocation5 + $0x304] ss:$8 sps:$4 sm:$0xff]   ;;  %v2340_v23 = vld [vmem:[#allocation5 + $0x394] ss:$8 sps:$4 sm:$0xff]  }
  0xca   : > { %1182 = vmatprep.subr.bf16.mxu1 %v2365_v24  ;;  %v2338_v24 = vld [vmem:[#allocation5 + $0x390] ss:$8 sps:$4 sm:$0xff]  }
  0xcc   : > { %1237 = vmatpush1.bf16.msra.mxu0 %v2231_v55  ;;  %v1877_v55 = vcombine.low %v2895_v46, %v2895_v46  ;;  %v2399_v46 = vld [vmem:[#allocation7 + $0x70] ss:$8 sps:$4 sm:$0xff]  }
  0xcd   : > { %1238 = vmatprep.subr.bf16.mxu0 %v2236_v56  ;;  %1183 = vmatpush1.bf16.msra.mxu1 %v2367_v27  ;;  %v2398_v56 = vld [vmem:[#allocation7 + $0x64] ss:$8 sps:$4 sm:$0xff]   ;;  %v2352_v27 = vld [vmem:[#allocation5 + $0x3b4] ss:$8 sps:$4 sm:$0xff]  }
  0xce   : > { %1524 = vmatprep.subr.bf16.mxu1 %v2380_v29  ;;  %v2358_v29 = vld [vmem:[#allocation5 + $0x3c4] ss:$8 sps:$4 sm:$0xff]  }
  0xd0   : > { %1239 = vmatpush1.bf16.msra.mxu0 %v2234_v59  ;;  %1185 = vmatmul.mubr.bf16.vlgmr.msra.gmra.mrb[0].mxu1 %v1873_v32  ;;  %v2292_v59 = vld [vmem:[#allocation5 + $0x314] ss:$8 sps:$4 sm:$0xff]   ;;  %v2362_v32 = vld [vmem:[#allocation5 + $0x3d0] ss:$8 sps:$4 sm:$0xff]  }
  0xd1   : > { %1240 = vmatprep.subr.bf16.mxu0 %v2239_v60  ;;  %1525 = vmatpush1.bf16.msra.mxu1 %v2378_v31  ;;  %v2396_v60 = vld [vmem:[#allocation7 + $0x60] ss:$8 sps:$4 sm:$0xff]   ;;  %v2364_v31 = vld [vmem:[#allocation5 + $0x3d4] ss:$8 sps:$4 sm:$0xff]  }
  0xd2   : > { %1526 = vmatprep.subr.bf16.mxu1 %v2383_v33  ;;  %v2370_v33 = vld [vmem:[#allocation5 + $0x3e4] ss:$8 sps:$4 sm:$0xff]  }
  0xd4   : > { %1241 = vmatpush1.bf16.msra.mxu0 %v2237_v63  ;;  %v2298_v63 = vld [vmem:[#allocation5 + $0x324] ss:$8 sps:$4 sm:$0xff]  }
  0xd5   : > { %1242 = vmatprep.subr.bf16.mxu0 %v2242_v0  ;;  %1527 = vmatpush1.bf16.msra.mxu1 %v2381_v36  ;;  %v2404_v0 = vld [vmem:[#allocation7 + $0x84] ss:$8 sps:$4 sm:$0xff]   ;;  %v2373_v36 = vld [vmem:[#allocation5 + $0x3f0] ss:$8 sps:$4 sm:$0xff]  }
  0xd6   : > { %1528 = vmatprep.subr.bf16.mxu1 %v2386_v37  ;;  %v1879_v37 = vcombine.low %v2903_v53, %v2903_v53  ;;  %v472_v53 = vld [vmem:[%s2971_s2] sm:$0x3] }
  0xd8   : > { %1243 = vmatpush1.bf16.msra.mxu0 %v2240_v3  ;;  %v2402_v3 = vld [vmem:[#allocation7 + $0x80] ss:$8 sps:$4 sm:$0xff]  }
  0xd9   : > { %1244 = vmatprep.subr.bf16.mxu0 %v2245_v4  ;;  %1529 = vmatpush1.bf16.msra.mxu1 %v2384_v40  ;;  %v2407_v4 = vld [vmem:[#allocation7 + $0x94] ss:$8 sps:$4 sm:$0xff]   ;;  %v2422_v40 = vld [vmem:[#allocation7 + $0xe4] ss:$8 sps:$4 sm:$0xff]  }
  0xda   : > { %1530 = vmatprep.subr.bf16.mxu1 %v2389_v41  ;;  %v2420_v41 = vld [vmem:[#allocation7 + $0xe0] ss:$8 sps:$4 sm:$0xff]  }
  0xdc   : > { %1245 = vmatpush1.bf16.msra.mxu0 %v2243_v7  ;;  %v2405_v7 = vld [vmem:[#allocation7 + $0x90] ss:$8 sps:$4 sm:$0xff]  }
  0xdd   : > { %1246 = vmatprep.subr.bf16.mxu0 %v2248_v8  ;;  %1531 = vmatpush1.bf16.msra.mxu1 %v2387_v44  ;;  %v2410_v8 = vld [vmem:[#allocation7 + $0xa4] ss:$8 sps:$4 sm:$0xff]  }
  0xde   : > { %1532 = vmatprep.subr.bf16.mxu1 %v2392_v45  ;;  %v2426_v44 = vld [vmem:[#allocation8 + $0x40] sm:$0xff]  }
  0xe0   : > { %1247 = vmatpush1.bf16.msra.mxu0 %v2246_v13  ;;  %v2314_v13 = vld [vmem:[#allocation5 + $0x350] ss:$8 sps:$4 sm:$0xff]  }
  0xe1   : > { %1248 = vmatprep.subr.bf16.mxu0 %v2251_v14  ;;  %1533 = vmatpush1.bf16.msra.mxu1 %v2390_v49  ;;  %v2322_v14 = vld [vmem:[#allocation5 + $0x364] ss:$8 sps:$4 sm:$0xff]  }
  0xe2   : > { %1534 = vmatprep.subr.bf16.mxu1 %v2395_v50  ;;  %v474_v50 = vlaneseq }
  0xe4   : > { %1249 = vmatpush1.bf16.msra.mxu0 %v2249_v17  ;;  %v2320_v17 = vld [vmem:[#allocation5 + $0x360] ss:$8 sps:$4 sm:$0xff]  }
  0xe5   : > { %1250 = vmatprep.subr.bf16.mxu0 %v2254_v18  ;;  %1535 = vmatpush1.bf16.msra.mxu1 %v2393_v54  ;;  %v2328_v18 = vld [vmem:[#allocation5 + $0x374] ss:$8 sps:$4 sm:$0xff]  }
  0xe6   : > { %1536 = vmatprep.subr.bf16.mxu1 %v2398_v56 }
  0xe8   : > { %1251 = vmatpush1.bf16.msra.mxu0 %v2252_v21  ;;  %v2334_v21 = vld [vmem:[#allocation5 + $0x384] ss:$8 sps:$4 sm:$0xff]  }
  0xe9   : > { %1252 = vmatprep.subr.bf16.mxu0 %v2257_v22  ;;  %1537 = vmatpush1.bf16.msra.mxu1 %v2396_v60  ;;  %v2332_v22 = vld [vmem:[#allocation5 + $0x380] ss:$8 sps:$4 sm:$0xff]  }
  0xea   : > { %1538 = vmatprep.subr.bf16.mxu1 %v2401_v61 }
  0xec   : > { %1253 = vmatpush1.bf16.msra.mxu0 %v2255_v25  ;;  %v2346_v25 = vld [vmem:[#allocation5 + $0x3a4] ss:$8 sps:$4 sm:$0xff]  }
  0xed   : > { %1254 = vmatprep.subr.bf16.mxu0 %v2260_v26  ;;  %1539 = vmatpush1.bf16.msra.mxu1 %v2399_v46  ;;  %v2344_v26 = vld [vmem:[#allocation5 + $0x3a0] ss:$8 sps:$4 sm:$0xff]  }
  0xee   : > { %1540 = vmatprep.subr.bf16.mxu1 %v2404_v0 }
  0xf0   : > { %1255 = vmatpush1.bf16.msra.mxu0 %v2258_v28  ;;  %v2350_v28 = vld [vmem:[#allocation5 + $0x3b0] ss:$8 sps:$4 sm:$0xff]  }
  0xf1   : > { %1256 = vmatprep.subr.bf16.mxu0 %v2263_v30  ;;  %1541 = vmatpush1.bf16.msra.mxu1 %v2402_v3  ;;  %v2356_v30 = vld [vmem:[#allocation5 + $0x3c0] ss:$8 sps:$4 sm:$0xff]  }
  0xf2   : > { %1542 = vmatprep.subr.bf16.mxu1 %v2407_v4  ;;  %v2427_v3 = vld [vmem:[#allocation8] sm:$0xff]  }
  0xf4   : > { %1257 = vmatpush1.bf16.msra.mxu0 %v2261_v34  ;;  %v2368_v34 = vld [vmem:[#allocation5 + $0x3e0] ss:$8 sps:$4 sm:$0xff]  }
  0xf5   : > { %1258 = vmatprep.subr.bf16.mxu0 %v2266_v35  ;;  %1543 = vmatpush1.bf16.msra.mxu1 %v2405_v7  ;;  %v2375_v35 = vld [vmem:[#allocation5 + $0x3f4] ss:$8 sps:$4 sm:$0xff]  }
  0xf6   : > { %1544 = vmatprep.subr.bf16.mxu1 %v2410_v8  ;;  %v2430_v7 = vld [vmem:[#allocation8 + $0x50] sm:$0xff]  }
  0xf7   : > { %v2431_v8 = vld [vmem:[#allocation8 + $0x10] sm:$0xff]  }
  0xf8   : > { %1259 = vmatpush1.bf16.msra.mxu0 %v2264_v38  ;;  %v2417_v38 = vld [vmem:[#allocation7 + $0xd0] ss:$8 sps:$4 sm:$0xff]  }
  0xf9   : > { %1260 = vmatprep.subr.bf16.mxu0 %v2269_v39  ;;  %1545 = vmatpush1.bf16.msra.mxu1 %v2408_v11  ;;  %v2419_v39 = vld [vmem:[#allocation7 + $0xd4] ss:$8 sps:$4 sm:$0xff]   ;;  %v2434_v11 = vld [vmem:[#allocation8 + $0x60] sm:$0xff]  }
  0xfa   : > { %1546 = vmatprep.subr.bf16.mxu1 %v2413_v12  ;;  %v2435_v12 = vld [vmem:[#allocation8 + $0x20] sm:$0xff]  }
  0xfc   : > { %1261 = vmatpush1.bf16.msra.mxu0 %v2267_v42  ;;  %v2425_v42 = vld [vmem:[#allocation7 + $0xf4] ss:$8 sps:$4 sm:$0xff]  }
  0xfd   : > { %1262 = vmatprep.subr.bf16.mxu0 %v2272_v43  ;;  %1547 = vmatpush1.bf16.msra.mxu1 %v2411_v15  ;;  %v2423_v43 = vld [vmem:[#allocation7 + $0xf0] ss:$8 sps:$4 sm:$0xff]  }
  0xfe   : > { %1548 = vmatprep.subr.bf16.mxu1 %v2416_v16  ;;  %v2438_v15 = vld [vmem:[#allocation8 + $0x70] sm:$0xff]  }
  0xff   : > { %v2439_v16 = vld [vmem:[#allocation8 + $0x30] sm:$0xff]  }
 0x100   : > { %1263 = vmatpush1.bf16.msra.mxu0 %v2270_v47 }
 0x101   : > { %1264 = vmatprep.subr.bf16.mxu0 %v2278_v48  ;;  %1549 = vmatpush1.bf16.msra.mxu1 %v2414_v19  ;;  %v1352_v19 = vld [vmem:[%s2973_s4] sm:$0x3] }
 0x102   : > { %1550 = vmatprep.subr.bf16.mxu1 %v2419_v39 }
 0x104   : > { %1265 = vmatpush1.bf16.msra.mxu0 %v2276_v51  ;;  %v475_v51 = vshrl.u32 %v474_v50, 7 }
 0x105   : > { %1275 = vmatprep.subr.bf16.mxu0 %v2286_v52  ;;  %1551 = vmatpush1.bf16.msra.mxu1 %v2417_v38 }
 0x106   : > { %1552 = vmatprep.subr.bf16.mxu1 %v2422_v40  ;;  %v476_v52 = vsub.s32 0, %v475_v51  ;;  %v480_v54 = vsub.s32 1, %v475_v51 }
 0x107   : > { %1267 = vmatmul.mubr.bf16.vlgmr.msra.gmra.mrb[0].mxu0 %v1877_v55 }
 0x108   : > { %1276 = vmatpush1.bf16.msra.mxu0 %v2284_v57  ;;  %1307 = vmatprep.mubr.bf16.mxu0 %v1880_v58  ;;  %v477_v55 = vrot.slane %v472_v53, %v476_v52  ;;  %v481_v56 = vrot.slane %v472_v53, %v480_v54 }
 0x109   : > { %1277 = vmatprep.subr.bf16.mxu0 %v2292_v59  ;;  %1553 = vmatpush1.bf16.msra.mxu1 %v2420_v41 }
 0x10a   : > { %1554 = vmatprep.subr.bf16.mxu1 %v2425_v42 }
 0x10c   : > { %1278 = vmatpush1.bf16.msra.mxu0 %v2290_v62 }
 0x10d   : > { %1279 = vmatprep.subr.bf16.mxu0 %v2298_v63  ;;  %1555 = vmatpush1.bf16.msra.mxu1 %v2423_v43 }
 0x10e   : > { %2063 = vmatprep.subr.bf16.mxu1 %v2426_v44 }
 0x110   : > { %1280 = vmatpush1.bf16.msra.mxu0 %v2296_v1 }
 0x111   : > { %1281 = vmatprep.subr.bf16.mxu0 %v2304_v2 }
 0x114   : > { %1282 = vmatpush1.bf16.msra.mxu0 %v2302_v5  ;;  %v2428_v5 = vld [vmem:[#allocation8 + $0x48] sm:$0xff]  }
 0x115   : > { %1283 = vmatprep.subr.bf16.mxu0 %v2310_v6  ;;  %v2429_v6 = vld [vmem:[#allocation8 + $0x8] sm:$0xff]  }
 0x118   : > { %1284 = vmatpush1.bf16.msra.mxu0 %v2308_v9  ;;  %v2432_v9 = vld [vmem:[#allocation8 + $0x58] sm:$0xff]  }
 0x119   : > { %1285 = vmatprep.subr.bf16.mxu0 %v2316_v10  ;;  %v2433_v10 = vld [vmem:[#allocation8 + $0x18] sm:$0xff]  }
 0x11c   : > { %1286 = vmatpush1.bf16.msra.mxu0 %v2314_v13  ;;  %v2436_v13 = vld [vmem:[#allocation8 + $0x68] sm:$0xff]  }
 0x11d   : > { %1287 = vmatprep.subr.bf16.mxu0 %v2322_v14  ;;  %v2437_v14 = vld [vmem:[#allocation8 + $0x28] sm:$0xff]  }
 0x120   : > { %1288 = vmatpush1.bf16.msra.mxu0 %v2320_v17  ;;  %v2440_v17 = vld [vmem:[#allocation8 + $0x78] sm:$0xff]  }
 0x121   : > { %1289 = vmatprep.subr.bf16.mxu0 %v2328_v18  ;;  %v2441_v18 = vld [vmem:[#allocation8 + $0x38] sm:$0xff]  }
 0x124   : > { %1290 = vmatpush1.bf16.msra.mxu0 %v2326_v20  ;;  %v1357_v20 = vrot.slane %v1352_v19, %v476_v52 }
 0x125   : > { %1291 = vmatprep.subr.bf16.mxu0 %v2334_v21  ;;  %v1361_v21 = vrot.slane %v1352_v19, %v480_v54 }
 0x128   : > { %1292 = vmatpush1.bf16.msra.mxu0 %v2332_v22 }
 0x129   : > { %1293 = vmatprep.subr.bf16.mxu0 %v2340_v23 }
 0x12c   : > { %1294 = vmatpush1.bf16.msra.mxu0 %v2338_v24 }
 0x12d   : > { %1295 = vmatprep.subr.bf16.mxu0 %v2346_v25 }
 0x130   : > { %1296 = vmatpush1.bf16.msra.mxu0 %v2344_v26 }
 0x131   : > { %1297 = vmatprep.subr.bf16.mxu0 %v2352_v27 }
 0x134   : > { %1298 = vmatpush1.bf16.msra.mxu0 %v2350_v28 }
 0x135   : > { %1299 = vmatprep.subr.bf16.mxu0 %v2358_v29 }
 0x138   : > { %1300 = vmatpush1.bf16.msra.mxu0 %v2356_v30 }
 0x139   : > { %1301 = vmatprep.subr.bf16.mxu0 %v2364_v31 }
 0x13c   : > { %1302 = vmatpush1.bf16.msra.mxu0 %v2362_v32 }
 0x13d   : > { %1303 = vmatprep.subr.bf16.mxu0 %v2370_v33  ;;  %v2041_v33 = vld [vmem:[%s2975_s6] ss:$0 sm:$0xff] }
 0x140   : > { %1304 = vmatpush1.bf16.msra.mxu0 %v2368_v34 }
 0x141   : > { %1305 = vmatprep.subr.bf16.mxu0 %v2375_v35 }
 0x144   : > { %1306 = vmatpush1.bf16.msra.mxu0 %v2373_v36 }
 0x147   : > { %1308 = vmatmul.mubr.bf16.vlgmr.msra.gmra.mrb[0].mxu0 %v1879_v37 }
 0x1a3   : > { %v1186_v45 = vpop.f32.mrb[0].mxu1 }
 0x1a4   : > { %v1188_v47 = vpop.f32.mrb[1].mxu1  ;;  %v1187_v57 = vadd.f32 %v1186_v45, %v477_v55 }
 0x1a5   : > { %v1190_v48 = vpop.f32.mrb[2].mxu1  ;;  %v1189_v58 = vadd.f32 %v1188_v47, %v481_v56 }
 0x1a6   : > { %v1191_v49 = vpop.f32.mrb[3].mxu1 }
 0x21a   : > { %v1309_v59 = vpop.f32.mrb[0].mxu0 }
 0x21b   : > { %v2086_v60 = vadd.f32 %v1309_v59, %v1187_v57  ;;  %v1311_v61 = vpop.f32.mrb[1].mxu0 }
 0x21c   : > { %v2088_v62 = vadd.f32 %v1311_v61, %v1189_v58  ;;  %v1313_v63 = vpop.f32.mrb[2].mxu0 }
 0x21d   : > { %v1316_v46 = vmax.f32 %v2086_v60, 0.0  ;;  %v1314_v0 = vpop.f32.mrb[3].mxu0 }
 0x21e   : > { %v1317_v1 = vmax.f32 %v2088_v62, 0.0 }
 0x21f   : > { %v1318_v4 = vpack.c.bf16 %v1316_v46, %v1316_v46 }
 0x220   : > { %v1319_v2 = vpack.c.bf16 %v1317_v1, %v1317_v1 }
 0x222   : > { %1556 = vmatprep.mubr.bf16.mxu1 %v1319_v2 }
 0x223   : > { %1557 = vmatmul.mubr.bf16.vlgmr.msra.gmra.mrb[4].mxu1 %v1318_v4 }
 0x224   : > { %2064 = vmatpush3.bf16.msra.mxu1 %v2427_v3 }
 0x225   : > { %2065 = vmatprep.subr.bf16.mxu1 %v2428_v5 }
 0x228   : > { %2066 = vmatpush3.bf16.msra.mxu1 %v2429_v6 }
 0x229   : > { %2067 = vmatprep.subr.bf16.mxu1 %v2430_v7 }
 0x22c   : > { %2068 = vmatpush3.bf16.msra.mxu1 %v2431_v8 }
 0x22d   : > { %2069 = vmatprep.subr.bf16.mxu1 %v2432_v9 }
 0x230   : > { %2070 = vmatpush3.bf16.msra.mxu1 %v2433_v10 }
 0x231   : > { %2071 = vmatprep.subr.bf16.mxu1 %v2434_v11 }
 0x234   : > { %2072 = vmatpush3.bf16.msra.mxu1 %v2435_v12 }
 0x235   : > { %2073 = vmatprep.subr.bf16.mxu1 %v2436_v13 }
 0x238   : > { %2074 = vmatpush3.bf16.msra.mxu1 %v2437_v14 }
 0x239   : > { %2075 = vmatprep.subr.bf16.mxu1 %v2438_v15 }
 0x23c   : > { %2076 = vmatpush3.bf16.msra.mxu1 %v2439_v16 }
 0x23d   : > { %2077 = vmatprep.subr.bf16.mxu1 %v2440_v17 }
 0x240   : > { %2078 = vmatpush3.bf16.msra.mxu1 %v2441_v18 }
 0x2f6   : > { %v1558_v22 = vpop.f32.mrb[4].mxu1 }
 0x2f7   : > { %v1559_v23 = vadd.f32 %v1558_v22, %v1357_v20  ;;  %v1560_v24 = vpop.f32.mrb[5].mxu1 }
 0x2f8   : > { %v1561_v25 = vadd.f32 %v1560_v24, %v1361_v21  ;;  %v1562_v26 = vpop.f32.mrb[6].mxu1 }
 0x2f9   : > { %v1565_v27 = vmax.f32 %v1559_v23, 0.0  ;;  %v1563_v28 = vpop.f32.mrb[7].mxu1 }
 0x2fa   : > { %v1566_v29 = vmax.f32 %v1561_v25, 0.0 }
 0x2fb   : > { %v1567_v31 = vpack.c.bf16 %v1565_v27, %v1565_v27 }
 0x2fc   : > { %v1568_v30 = vpack.c.bf16 %v1566_v29, %v1566_v29 }
 0x2fe   : > { %1736 = vmatprep.mubr.bf16.mxu1 %v1568_v30 }
 0x2ff   : > { %1737 = vmatmul.mubr.bf16.vlgmr.msra.gmra.mrb[8].mxu1 %v1567_v31 }
 0x3d2   : > { %v2079_v32 = vpop.f32.mrb[8].mxu1 }
 0x3d3   : > { %v2080_v34 = vpop.f32.mrb[9].mxu1 }
 0x3d4   : > { %v2081_v35 = vadd.f32 %v2080_v34, %v2079_v32  ;;  %v2082_v36 = vpop.f32.mrb[10].mxu1 }
 0x3d5   : > { %v2083_v37 = vpop.f32.mrb[11].mxu1 }
 0x3d6   : > { %v1739_v38 = vadd.f32 %v2081_v35, %v2041_v33 }
 0x3d8   : > { %1744 = vst [vmem:[%s338_s29] sm:$0xff] %v1739_v38 }
 0x3d9   : > { %2569 = shalt.err (!%p2566_p4)
}
 0x3da   : > { %s2570_s15 = scalar_lea.hbm %s2925_s21, 128  ;;  %s2574_s13 = scalar_lea.hbm %s2976_s7, 256 }
 0x3db   : > { %p2571_p0 = scmp.ne.s32.totalorder %s2925_s21, %s2570_s15  ;;  %p2575_p8 = scmp.lt.u32.totalorder %s2925_s21, %s2976_s7 }
 0x3dc   : > { %p2576_p13 = scmp.lt.u32.totalorder %s2574_s13, %s2570_s15  ;;  %p2578_p10 = scmp.lt.u32.totalorder %s2570_s15, %s2925_s21 }
 0x3dd   : > { %p2572_p9 = pnand %p2571_p0, %p2826_p5 }
 0x3de   : > { %p2577_p6 = por %p2576_p13, %p2575_p8 }
 0x3df   : > { %p2573_p11 = pneg %p2572_p9 }
 0x3e0   : > { %p2579_p3 = por %p2578_p10, %p2577_p6 }
 0x3e2   : > { %p2580_p7 = pnand %p2579_p3, %p2573_p11 }
 0x3e4   : > { %2583 = shalt.err (!%p2580_p7)
}
 0x3e5   : > { %2111 = dma.vmem_to_hbm [thread:$0]  (%p2826_p5), %s2927_s11, 128, %s2925_s21, %s1746_s16  }
 0x3e6 PF: > { %s2996_s29 = sld [smem:[#allocation15_spill]]  ;;  %s1771_s17 = sand.u32 1, %s2618_s24  }
 0x3e7   : > { %p2998_p2 = scmp.ge.s32.totalorder %s2630_s27, 2  ;;  %s1772_s18 = scalar_lea.sflag [#allocation4], %s1771_s17 }
 0x3ec   : > { %p2997_p12 = scmp.ne.s32.totalorder %s2996_s29, 0 }
 0x3ee   : > { %p2128_p1 = pnand %p2998_p2, %p2997_p12 }
 0x3f0   : > { %2613 = dma.done.wait (!%p2128_p1), %s1772_s18, 128  }
 0x3f1   : > { %2615 = vsyncadd (!%p2128_p1), %s1772_s18, 4294967168  ;;  %p22_p4 = scmp.ge.s32.totalorder %s2812_s8, 4   ;;  %s2999_s24 = smov %s2622_s25 }
 0x3f2   : > { %s3000_s25 = smov %s2626_s26  ;;  %s3001_s26 = smov %s2822_s19 }
 0x3f3   : > { %s3002_s27 = smov %s2812_s8  ;;  %24 = sbr.rel (!%p22_p4) target bundleno = 7 (0x7), region = 105 }
 0x3fa   :  { %1777 = vsyncpa [#allocation3], 1 }
 0x3fb   :  { %1779 = vsyncpa [#allocation3 + $0x1], 1 }
 0x3fc   :  { %1780 = vsyncpa [#allocation6], 1 }
 0x3fd   :  { %1781 = vsyncpa [#allocation9], 1 }
 0x3fe   :  { %1782 = vsyncpa [#allocation4], 1 }
 0x3ff   :  { %1784 = vsyncpa [#allocation4 + $0x1], 1 }

</bundles_post_ra>
